<compile_context>
chip_gen: v7x
topology: tpu7x:2x2x1
jax: 0.10.0
libtpu: 0.0.40
codegen_flags: <defaults>
</compile_context>

<pallas_src>
import jax
import jax.numpy as jnp
from jax.experimental import pallas as pl
from jax.experimental.pallas import tpu as pltpu

STRIDE = 32
NUM_CLASSES = 20
NUM_ANCHORS = 5
LEAKY_SLOPE = 0.1
HEAD_OUT = 128            # fused predictor width: 5 obj + 100 cls + 20 reg + 3 pad
TILE_M_TARGET = 1024      # per review: ~86% of HBM roofline, ~22 MiB VMEM footprint


def _round_up(n, m):
    return ((n + m - 1) // m) * m


def _pick_tiling(m, target):
    """Row tile + padded row count.

    Prefers an even number of tiles (v7x: two TCs shard the 'parallel' axis)
    and shrinks the tile instead of padding a whole extra tile (v5e: padded
    rows are real MXU cycles).  Tiles are multiples of 16 (bf16 sublane tile).
    """
    n = max(1, -(-m // target))
    if m >= 16 and n % 2 == 1:
        n += 1
    tile = _round_up(-(-m // n), 16)
    return tile, tile * n


# ----------------------------- Pallas kernel -------------------------------

def _lrelu_bf16(h):
    """LeakyReLU as max(h, 0.1*h) on the bf16-cast activation."""
    hb = h.astype(jnp.bfloat16)
    return jnp.maximum(hb, LEAKY_SLOPE * hb)


def _dot(a, w_ref):
    return jnp.dot(a, w_ref[...], preferred_element_type=jnp.float32)


def yolo_trunk_kernel(xp_ref, wbb_ref, bbb_ref, wnk_ref, bnk_ref,
                      whh_ref, bhh_ref, whd_ref, bhd_ref, out_ref):
    """normalize(folded) -> backbone -> neck -> fused head -> fused predictors.

    Processes one (TILE_M, Cin) row tile per grid step; weights are resident.
    Output is one lane-dense (TILE_M, 128) bf16 slab:
    [obj(5) | cls(100) | reg(20) | pad(3)].
    """
    x = xp_ref[...]                                          # (tile, Cin) bf16
    feat = _lrelu_bf16(_dot(x, wbb_ref) + bbb_ref[...])      # backbone (synthetic, Normalize folded)
    feat = _lrelu_bf16(_dot(feat, wnk_ref) + bnk_ref[...])   # neck -> head_dim
    hfeat = _lrelu_bf16(_dot(feat, whh_ref) + bhh_ref[...])  # fused head: [cls_feat | reg_feat]
    out_ref[...] = (_dot(hfeat, whd_ref) + bhd_ref[...]).astype(out_ref.dtype)


# ------------------------------- JAX glue ----------------------------------

def generate_anchors(fmp_h, fmp_w, anchor_size):
    # Mirrors YOLOv2.generate_anchors (torch.meshgrid default = 'ij').
    ys, xs = jnp.meshgrid(jnp.arange(fmp_h), jnp.arange(fmp_w), indexing="ij")
    xy = jnp.stack([xs, ys], axis=-1).astype(jnp.float32).reshape(-1, 2)      # (HW, 2)
    xy = jnp.repeat(xy[:, None, :], NUM_ANCHORS, axis=1).reshape(-1, 2)       # (HW*A, 2)
    wh = jnp.tile(anchor_size[None, :, :], (fmp_h * fmp_w, 1, 1)).reshape(-1, 2)
    return jnp.concatenate([xy, wh], axis=-1)                                 # (HW*A, 4)


def init_params(key, in_ch=3, feat_dim=256, neck_dim=256):
    assert in_ch == 3, "ImageNet Normalize constants assume 3 input channels"
    ks = jax.random.split(key, 7)
    cin = in_ch * STRIDE * STRIDE
    A, NC = NUM_ANCHORS, NUM_CLASSES

    def w(k, fi, fo):
        return jax.random.normal(k, (fi, fo), jnp.float32) / jnp.sqrt(jnp.float32(fi))

    # transforms.Normalize constants, expanded to the patchified (C, 32, 32) layout.
    mean = jnp.repeat(jnp.array([0.485, 0.456, 0.406], jnp.float32), STRIDE * STRIDE)   # (Cin,)
    inv_std = 1.0 / jnp.repeat(jnp.array([0.229, 0.224, 0.225], jnp.float32), STRIDE * STRIDE)

    # Backbone weight with Normalize folded in:  ((x - mean) * inv_std) @ W + b
    #   == x @ (inv_std[:,None] * W) + (b - (mean * inv_std) @ W)
    w_bb_raw = w(ks[0], cin, feat_dim)
    b_bb_raw = jnp.zeros((1, feat_dim), jnp.float32)
    w_bb = w_bb_raw * inv_std[:, None]
    b_bb = b_bb_raw - (mean * inv_std)[None, :] @ w_bb_raw

    # Fused head weight: feat @ [w_ch | w_rh] -> [cls_feat | reg_feat] (one matmul,
    # no in-kernel concatenate).  w_hd row order matches this layout unchanged.
    w_ch = w(ks[2], neck_dim, neck_dim)
    w_rh = w(ks[3], neck_dim, neck_dim)
    w_hh = jnp.concatenate([w_ch, w_rh], axis=1)              # (neck, 2*neck)
    b_hh = jnp.zeros((1, 2 * neck_dim), jnp.float32)

    # Fused predictor weight: [cls_feat | reg_feat] @ W_hd -> [obj | cls | reg | pad]
    w_obj = w(ks[4], neck_dim, A)
    w_cls = w(ks[5], neck_dim, A * NC)
    w_reg = w(ks[6], neck_dim, A * 4)
    bias_value = -jnp.log(jnp.float32((1.0 - 0.01) / 0.01))   # init_bias()
    w_hd = jnp.zeros((2 * neck_dim, HEAD_OUT), jnp.float32)
    w_hd = w_hd.at[:neck_dim, A:A + A * NC].set(w_cls)                    # cls from cls_feat
    w_hd = w_hd.at[neck_dim:, 0:A].set(w_obj)                             # obj from reg_feat
    w_hd = w_hd.at[neck_dim:, A + A * NC:A + A * NC + A * 4].set(w_reg)   # reg from reg_feat
    b_hd = jnp.zeros((1, HEAD_OUT), jnp.float32)
    b_hd = b_hd.at[:, 0:A + A * NC].set(bias_value)   # reference biases BOTH obj and cls

    bf16 = jnp.bfloat16
    return {
        "w_bb": w_bb.astype(bf16), "b_bb": b_bb,
        "w_nk": w(ks[1], feat_dim, neck_dim).astype(bf16),
        "b_nk": jnp.zeros((1, neck_dim), jnp.float32),
        "w_hh": w_hh.astype(bf16), "b_hh": b_hh,
        "w_hd": w_hd.astype(bf16), "b_hd": b_hd,
        # deterministic YOLOv2-VOC style anchor sizes (pixels)
        "anchor_size": jnp.array([[17., 25.], [55., 75.], [92., 206.],
                                  [202., 21.], [289., 311.]], jnp.float32),
    }


def yolov2_forward(x, params, tile_m_target=TILE_M_TARGET):
    """Training-mode forward: returns the outputs dict of YOLOv2.forward."""
    B, C, H, W = x.shape
    Hf, Wf = H // STRIDE, W // STRIDE
    HW = Hf * Wf
    M = B * HW
    Cin = C * STRIDE * STRIDE
    A, NC = NUM_ANCHORS, NUM_CLASSES
    feat_dim = params["w_bb"].shape[1]
    neck_dim = params["w_nk"].shape[1]

    # Space-to-depth patchify; bf16-cast FIRST so the materialized XLA
    # transpose moves half the bytes.  Column order is (C, ky, kx).
    xp = x.astype(jnp.bfloat16)
    xp = xp.reshape(B, C, Hf, STRIDE, Wf, STRIDE).transpose(0, 2, 4, 1, 3, 5)
    xp = xp.reshape(M, Cin)

    tile_m, m_pad = _pick_tiling(M, tile_m_target)
    if m_pad != M:
        xp = jnp.pad(xp, ((0, m_pad - M), (0, 0)))
    grid = (m_pad // tile_m,)

    row_spec = pl.BlockSpec((tile_m, Cin), lambda i: (i, 0))
    out_spec = pl.BlockSpec((tile_m, HEAD_OUT), lambda i: (i, 0))

    def resident(arr):  # weights / biases stay pinned across the row grid
        return pl.BlockSpec(arr.shape, lambda i: (0, 0))

    weight_args = (params["w_bb"], params["b_bb"], params["w_nk"], params["b_nk"],
                   params["w_hh"], params["b_hh"], params["w_hd"], params["b_hd"])

    flops = 2 * m_pad * (Cin * feat_dim + feat_dim * neck_dim
                         + neck_dim * (2 * neck_dim) + (2 * neck_dim) * HEAD_OUT)
    bytes_accessed = (m_pad * Cin * 2
                      + sum(int(a.size) * a.dtype.itemsize for a in weight_args)
                      + m_pad * HEAD_OUT * 2)

    head = pl.pallas_call(
        yolo_trunk_kernel,
        out_shape=jax.ShapeDtypeStruct((m_pad, HEAD_OUT), jnp.bfloat16),
        grid=grid,
        in_specs=[row_spec] + [resident(a) for a in weight_args],
        out_specs=out_spec,
        compiler_params=pltpu.CompilerParams(
            dimension_semantics=("parallel",),
            vmem_limit_bytes=32 * 1024 * 1024),
        cost_estimate=pl.CostEstimate(flops=int(flops), transcendentals=0,
                                      bytes_accessed=int(bytes_accessed)),
    )(xp, *weight_args)

    head = head[:M]                                   # drop row padding
    obj_f = head[:, 0:A]                              # (M, A)
    cls_f = head[:, A:A + A * NC]                     # (M, A*NC)
    reg_f = head[:, A + A * NC:A + A * NC + A * 4]    # (M, A*4)

    # permute(0,2,3,1).view(bs,-1,K): rows are already (B,H,W)-major and the
    # fused output channels are anchor-major, so these are pure reshapes.
    obj_pred = obj_f.astype(jnp.float32).reshape(B, HW * A, 1)
    cls_pred = cls_f.astype(jnp.float32).reshape(B, HW * A, NC)
    reg_pred = reg_f.astype(jnp.float32).reshape(B, HW * A, 4)

    # decode_boxes: (tx,ty,tw,th) -> (x1,y1,x2,y2); trivial elementwise work on
    # 20 lanes/cell, done in plain jnp (no extra kernel launch / masked stores).
    anchors = generate_anchors(Hf, Wf, params["anchor_size"])            # (HW*A, 4)
    ctr = (jax.nn.sigmoid(reg_pred[..., :2]) + anchors[None, :, :2]) * jnp.float32(STRIDE)
    wh = jnp.exp(reg_pred[..., 2:]) * anchors[None, :, 2:]
    box_pred = jnp.concatenate([ctr - 0.5 * wh, ctr + 0.5 * wh], axis=-1)

    return {"pred_obj": obj_pred, "pred_cls": cls_pred, "pred_box": box_pred,
            "stride": STRIDE, "fmp_size": (Hf, Wf)}


if __name__ == "__main__":
    key = jax.random.PRNGKey(0)
    kx, kp = jax.random.split(key)
    # small NCHW image batch in [0,1]; stride 32 -> 2x2 feature map
    x = jax.random.uniform(kx, (2, 3, 64, 64), dtype=jnp.float32)
    params = init_params(kp)

    out = yolov2_forward(x, params)
    jax.block_until_ready(out["pred_box"])

    Hf, Wf = out["fmp_size"]
    n_pred = Hf * Wf * NUM_ANCHORS
    assert out["pred_obj"].shape == (2, n_pred, 1)
    assert out["pred_cls"].shape == (2, n_pred, NUM_CLASSES)
    assert out["pred_box"].shape == (2, n_pred, 4)
    for k in ("pred_obj", "pred_cls", "pred_box"):
        assert bool(jnp.all(jnp.isfinite(out[k]))), f"non-finite values in {k}"

    print("KERNEL_OK")
</pallas_src>

<mosaic_0001>
module attributes {stable_mosaic.version = 11 : i64} {
  func.func @yolo_trunk_kernel(%arg0: i32, %arg1: memref<16x3072xbf16, #tpu.memory_space<vmem>>, %arg2: memref<3072x256xbf16, #tpu.memory_space<vmem>>, %arg3: memref<1x256xf32, #tpu.memory_space<vmem>>, %arg4: memref<256x256xbf16, #tpu.memory_space<vmem>>, %arg5: memref<1x256xf32, #tpu.memory_space<vmem>>, %arg6: memref<256x512xbf16, #tpu.memory_space<vmem>>, %arg7: memref<1x512xf32, #tpu.memory_space<vmem>>, %arg8: memref<512x128xbf16, #tpu.memory_space<vmem>>, %arg9: memref<1x128xf32, #tpu.memory_space<vmem>>, %arg10: memref<16x128xbf16, #tpu.memory_space<vmem>>) attributes {dimension_semantics = [#tpu.dimension_semantics<parallel>], iteration_bounds = array<i64: 1>, scalar_prefetch = 0 : i64, scratch_operands = 0 : i64, tpu.core_type = #tpu.core_type<tc>, window_params = [{transform_indices = @transform_0, window_bounds = array<i64: 16, 3072>}, {pipeline_mode = #tpu.pipeline_mode<synchronous>, transform_indices = @transform_1, window_bounds = array<i64: 3072, 256>}, {pipeline_mode = #tpu.pipeline_mode<synchronous>, transform_indices = @transform_2, window_bounds = array<i64: 1, 256>}, {pipeline_mode = #tpu.pipeline_mode<synchronous>, transform_indices = @transform_3, window_bounds = array<i64: 256, 256>}, {pipeline_mode = #tpu.pipeline_mode<synchronous>, transform_indices = @transform_4, window_bounds = array<i64: 1, 256>}, {pipeline_mode = #tpu.pipeline_mode<synchronous>, transform_indices = @transform_5, window_bounds = array<i64: 256, 512>}, {pipeline_mode = #tpu.pipeline_mode<synchronous>, transform_indices = @transform_6, window_bounds = array<i64: 1, 512>}, {pipeline_mode = #tpu.pipeline_mode<synchronous>, transform_indices = @transform_7, window_bounds = array<i64: 512, 128>}, {pipeline_mode = #tpu.pipeline_mode<synchronous>, transform_indices = @transform_8, window_bounds = array<i64: 1, 128>}, {transform_indices = @transform_9, window_bounds = array<i64: 16, 128>}]} {
    %c0 = arith.constant 0 : index
    %c0_0 = arith.constant 0 : index
    %0 = vector.load %arg1[%c0, %c0_0] : memref<16x3072xbf16, #tpu.memory_space<vmem>>, vector<16x3072xbf16>
    %c0_1 = arith.constant 0 : index
    %c0_2 = arith.constant 0 : index
    %1 = vector.load %arg2[%c0_1, %c0_2] : memref<3072x256xbf16, #tpu.memory_space<vmem>>, vector<3072x256xbf16>
    %cst = arith.constant dense<0.000000e+00> : vector<16x256xf32>
    %2 = tpu.matmul %0, %1, %cst {dimension_numbers = #tpu.dot_dimension_numbers<[1], [0], [0], [1], [0, 0, 1, 1], [], []>} : vector<16x3072xbf16>, vector<3072x256xbf16>, vector<16x256xf32> -> vector<16x256xf32>
    %c0_3 = arith.constant 0 : index
    %c0_4 = arith.constant 0 : index
    %3 = vector.load %arg3[%c0_3, %c0_4] : memref<1x256xf32, #tpu.memory_space<vmem>>, vector<1x256xf32>
    %4 = vector.broadcast %3 : vector<1x256xf32> to vector<16x256xf32>
    %5 = arith.addf %2, %4 : vector<16x256xf32>
    %6 = arith.truncf %5 : vector<16x256xf32> to vector<16x256xbf16>
    %cst_5 = arith.constant 1.000980e-01 : bf16
    %7 = vector.broadcast %cst_5 : bf16 to vector<16x256xbf16>
    %8 = arith.mulf %7, %6 : vector<16x256xbf16>
    %9 = arith.maximumf %6, %8 : vector<16x256xbf16>
    %c0_6 = arith.constant 0 : index
    %c0_7 = arith.constant 0 : index
    %10 = vector.load %arg4[%c0_6, %c0_7] : memref<256x256xbf16, #tpu.memory_space<vmem>>, vector<256x256xbf16>
    %cst_8 = arith.constant dense<0.000000e+00> : vector<16x256xf32>
    %11 = tpu.matmul %9, %10, %cst_8 {dimension_numbers = #tpu.dot_dimension_numbers<[1], [0], [0], [1], [0, 0, 1, 1], [], []>} : vector<16x256xbf16>, vector<256x256xbf16>, vector<16x256xf32> -> vector<16x256xf32>
    %c0_9 = arith.constant 0 : index
    %c0_10 = arith.constant 0 : index
    %12 = vector.load %arg5[%c0_9, %c0_10] : memref<1x256xf32, #tpu.memory_space<vmem>>, vector<1x256xf32>
    %13 = vector.broadcast %12 : vector<1x256xf32> to vector<16x256xf32>
    %14 = arith.addf %11, %13 : vector<16x256xf32>
    %15 = arith.truncf %14 : vector<16x256xf32> to vector<16x256xbf16>
    %cst_11 = arith.constant 1.000980e-01 : bf16
    %16 = vector.broadcast %cst_11 : bf16 to vector<16x256xbf16>
    %17 = arith.mulf %16, %15 : vector<16x256xbf16>
    %18 = arith.maximumf %15, %17 : vector<16x256xbf16>
    %c0_12 = arith.constant 0 : index
    %c0_13 = arith.constant 0 : index
    %19 = vector.load %arg6[%c0_12, %c0_13] : memref<256x512xbf16, #tpu.memory_space<vmem>>, vector<256x512xbf16>
    %cst_14 = arith.constant dense<0.000000e+00> : vector<16x512xf32>
    %20 = tpu.matmul %18, %19, %cst_14 {dimension_numbers = #tpu.dot_dimension_numbers<[1], [0], [0], [1], [0, 0, 1, 1], [], []>} : vector<16x256xbf16>, vector<256x512xbf16>, vector<16x512xf32> -> vector<16x512xf32>
    %c0_15 = arith.constant 0 : index
    %c0_16 = arith.constant 0 : index
    %21 = vector.load %arg7[%c0_15, %c0_16] : memref<1x512xf32, #tpu.memory_space<vmem>>, vector<1x512xf32>
    %22 = vector.broadcast %21 : vector<1x512xf32> to vector<16x512xf32>
    %23 = arith.addf %20, %22 : vector<16x512xf32>
    %24 = arith.truncf %23 : vector<16x512xf32> to vector<16x512xbf16>
    %cst_17 = arith.constant 1.000980e-01 : bf16
    %25 = vector.broadcast %cst_17 : bf16 to vector<16x512xbf16>
    %26 = arith.mulf %25, %24 : vector<16x512xbf16>
    %27 = arith.maximumf %24, %26 : vector<16x512xbf16>
    %c0_18 = arith.constant 0 : index
    %c0_19 = arith.constant 0 : index
    %28 = vector.load %arg8[%c0_18, %c0_19] : memref<512x128xbf16, #tpu.memory_space<vmem>>, vector<512x128xbf16>
    %cst_20 = arith.constant dense<0.000000e+00> : vector<16x128xf32>
    %29 = tpu.matmul %27, %28, %cst_20 {dimension_numbers = #tpu.dot_dimension_numbers<[1], [0], [0], [1], [0, 0, 1, 1], [], []>} : vector<16x512xbf16>, vector<512x128xbf16>, vector<16x128xf32> -> vector<16x128xf32>
    %c0_21 = arith.constant 0 : index
    %c0_22 = arith.constant 0 : index
    %30 = vector.load %arg9[%c0_21, %c0_22] : memref<1x128xf32, #tpu.memory_space<vmem>>, vector<1x128xf32>
    %31 = vector.broadcast %30 : vector<1x128xf32> to vector<16x128xf32>
    %32 = arith.addf %29, %31 : vector<16x128xf32>
    %33 = arith.truncf %32 : vector<16x128xf32> to vector<16x128xbf16>
    %c0_23 = arith.constant 0 : index
    %c0_24 = arith.constant 0 : index
    %34 = vector.load %arg10[%c0_23, %c0_24] : memref<16x128xbf16, #tpu.memory_space<vmem>>, vector<16x128xbf16>
    tpu.vector_store %arg10[%c0_23, %c0_24], %33 {strides = array<i32>} : memref<16x128xbf16, #tpu.memory_space<vmem>>, vector<16x128xbf16>,
    return
  }
  func.func @transform_0(%arg0: i32) -> (i32, i32) {
    %c0_i32 = arith.constant 0 : i32
    %c0_i32_0 = arith.constant 0 : i32
    return %arg0, %c0_i32 : i32, i32
  }
  func.func @transform_1(%arg0: i32) -> (i32, i32) {
    %c0_i32 = arith.constant 0 : i32
    %c0_i32_0 = arith.constant 0 : i32
    %c0_i32_1 = arith.constant 0 : i32
    return %c0_i32, %c0_i32_0 : i32, i32
  }
  func.func @transform_2(%arg0: i32) -> (i32, i32) {
    %c0_i32 = arith.constant 0 : i32
    %c0_i32_0 = arith.constant 0 : i32
    %c0_i32_1 = arith.constant 0 : i32
    return %c0_i32, %c0_i32_0 : i32, i32
  }
  func.func @transform_3(%arg0: i32) -> (i32, i32) {
    %c0_i32 = arith.constant 0 : i32
    %c0_i32_0 = arith.constant 0 : i32
    %c0_i32_1 = arith.constant 0 : i32
    return %c0_i32, %c0_i32_0 : i32, i32
  }
  func.func @transform_4(%arg0: i32) -> (i32, i32) {
    %c0_i32 = arith.constant 0 : i32
    %c0_i32_0 = arith.constant 0 : i32
    %c0_i32_1 = arith.constant 0 : i32
    return %c0_i32, %c0_i32_0 : i32, i32
  }
  func.func @transform_5(%arg0: i32) -> (i32, i32) {
    %c0_i32 = arith.constant 0 : i32
    %c0_i32_0 = arith.constant 0 : i32
    %c0_i32_1 = arith.constant 0 : i32
    return %c0_i32, %c0_i32_0 : i32, i32
  }
  func.func @transform_6(%arg0: i32) -> (i32, i32) {
    %c0_i32 = arith.constant 0 : i32
    %c0_i32_0 = arith.constant 0 : i32
    %c0_i32_1 = arith.constant 0 : i32
    return %c0_i32, %c0_i32_0 : i32, i32
  }
  func.func @transform_7(%arg0: i32) -> (i32, i32) {
    %c0_i32 = arith.constant 0 : i32
    %c0_i32_0 = arith.constant 0 : i32
    %c0_i32_1 = arith.constant 0 : i32
    return %c0_i32, %c0_i32_0 : i32, i32
  }
  func.func @transform_8(%arg0: i32) -> (i32, i32) {
    %c0_i32 = arith.constant 0 : i32
    %c0_i32_0 = arith.constant 0 : i32
    %c0_i32_1 = arith.constant 0 : i32
    return %c0_i32, %c0_i32_0 : i32, i32
  }
  func.func @transform_9(%arg0: i32) -> (i32, i32) {
    %c0_i32 = arith.constant 0 : i32
    %c0_i32_0 = arith.constant 0 : i32
    return %arg0, %c0_i32 : i32, i32
  }
}

</mosaic_0001>

<bundles_post_ra>
// kernel: tpu_custom_call.1
= control target key start
LH: loop header
LB: loop body
LE: loop exit
PB: predicated region body
PF: predicated region fallthrough
CT: control target
= control target key end

     0   :  { %14 = vsyncpa [#allocation3], 0  ;;  %s6206_s0 = inlined_call_operand.hbm [shape: bf16[16,3072], index: 0, kind: input, shape index: {}]   ;;  %s6207_s1 = inlined_call_operand.hbm [shape: bf16[3072,256], index: 1, kind: input, shape index: {}]   ;;  %s6208_s2 = inlined_call_operand.hbm [shape: f32[1,256], index: 2, kind: input, shape index: {}]   ;;  %s6209_s3 = inlined_call_operand.hbm [shape: bf16[256,256], index: 3, kind: input, shape index: {}]   ;;  %s6210_s4 = inlined_call_operand.hbm [shape: f32[1,256], index: 4, kind: input, shape index: {}]   ;;  %s6211_s5 = inlined_call_operand.hbm [shape: bf16[256,512], index: 5, kind: input, shape index: {}]   ;;  %s6212_s6 = inlined_call_operand.hbm [shape: f32[1,512], index: 6, kind: input, shape index: {}]   ;;  %s6213_s7 = inlined_call_operand.hbm [shape: bf16[512,128], index: 7, kind: input, shape index: {}]   ;;  %s6214_s8 = inlined_call_operand.hbm [shape: f32[1,128], index: 8, kind: input, shape index: {}]   ;;  %s6215_s9 = inlined_call_operand.hbm [shape: bf16[16,128], index: 9, kind: output, shape index: {}]  }
   0x1   :  { %15 = vsyncpa [#allocation6], 0 }
   0x2   :  { %16 = vsyncpa [#allocation9], 0 }
   0x3   :  { %17 = vsyncpa [#allocation12], 0 }
   0x4   :  { %18 = vsyncpa [#allocation15], 0 }
   0x5   :  { %19 = vsyncpa [#allocation4], 0  ;;  %s5904_s30 = smov [#allocation5]   ;;  %s5672_s13 = scalar_lea.hbm %s6207_s1, 49152 }
   0x6   :  { %s37_s10 = sshll.u32 %s5904_s30, 4  ;;  %p5673_p0 = scmp.ne.s32.totalorder %s6207_s1, %s5672_s13  ;;  %s38_s10 = int_to_ptr.vmem [resolvable:$true] %s37_s10 }
   0x7   :  { %p5676_p1 = scmp.lt.u32.totalorder %s5672_s13, %s6207_s1 }
   0x9   :  { %p5678_p2 = pnand %p5676_p1, %p5673_p0 }
   0xb   :  { %5681 = shalt.err (!%p5678_p2)
}
   0xc   :  { %s5682_s18 = scalar_lea.vmem %s38_s10, 49152  ;;  %p5687_p4 = scmp.lt.s32.totalorder %s38_s10, %s38_s10 }
   0xd   :  { %p5683_p3 = scmp.ne.s32.totalorder %s38_s10, %s5682_s18  ;;  %p5688_p5 = scmp.lt.s32.totalorder %s5682_s18, %s5682_s18 }
   0xf   :  { %p5689_p6 = por %p5688_p5, %p5687_p4 }
  0x11   :  { %p5690_p7 = pnand %p5689_p6, %p5683_p3 }
  0x13   :  { %5693 = shalt.err (!%p5690_p7)
}
  0x14   :  { %s5905_s19 = smov 128   ;;  %s5906_s20 = smov 8  }
  0x15   :  { %43 = dma.hbm_to_vmem [thread:$0]  %s6207_s1, 49152, %s38_s10, [#allocation6], %s5905_s19, %s5905_s19, %s5906_s20  }
  0x16   :  { %s5907_s23 = smov [#allocation8]   ;;  %s5908_s25 = smov [#allocation11]  }
  0x17   :  { %s59_s24 = sshll.u32 %s5907_s23, 4  ;;  %s81_s26 = sshll.u32 %s5908_s25, 4  ;;  %s60_s24 = int_to_ptr.vmem [resolvable:$true] %s59_s24  ;;  %s82_s26 = int_to_ptr.vmem [resolvable:$true] %s81_s26 }
  0x18   :  { %s5694_s29 = scalar_lea.hbm %s6209_s3, 4096 }
  0x19   :  { %p5695_p8 = scmp.ne.s32.totalorder %s6209_s3, %s5694_s29  ;;  %p5698_p9 = scmp.lt.u32.totalorder %s5694_s29, %s6209_s3 }
  0x1b   :  { %p5700_p10 = pnand %p5698_p9, %p5695_p8 }
  0x1d   :  { %5703 = shalt.err (!%p5700_p10)
}
  0x1e   :  { %s5704_s1 = scalar_lea.vmem %s60_s24, 4096  ;;  %p5709_p12 = scmp.lt.s32.totalorder %s60_s24, %s60_s24 }
  0x1f   :  { %p5705_p11 = scmp.ne.s32.totalorder %s60_s24, %s5704_s1  ;;  %p5710_p13 = scmp.lt.s32.totalorder %s5704_s1, %s5704_s1 }
  0x21   :  { %p5711_p0 = por %p5710_p13, %p5709_p12 }
  0x23   :  { %p5712_p1 = pnand %p5711_p0, %p5705_p11 }
  0x25   :  { %5715 = shalt.err (!%p5712_p1)
}
  0x26   :  { %65 = dma.hbm_to_vmem [thread:$0]  %s6209_s3, 4096, %s60_s24, [#allocation9], %s5905_s19, %s5905_s19, %s5906_s20  }
  0x27   :  { %s5716_s17 = scalar_lea.hbm %s6211_s5, 8192 }
  0x28   :  { %p5717_p2 = scmp.ne.s32.totalorder %s6211_s5, %s5716_s17  ;;  %p5720_p3 = scmp.lt.u32.totalorder %s5716_s17, %s6211_s5 }
  0x2a   :  { %p5722_p4 = pnand %p5720_p3, %p5717_p2 }
  0x2c   :  { %5725 = shalt.err (!%p5722_p4)
}
  0x2d   :  { %s5726_s25 = scalar_lea.vmem %s82_s26, 8192  ;;  %p5731_p6 = scmp.lt.s32.totalorder %s82_s26, %s82_s26 }
  0x2e   :  { %p5727_p5 = scmp.ne.s32.totalorder %s82_s26, %s5726_s25  ;;  %p5732_p7 = scmp.lt.s32.totalorder %s5726_s25, %s5726_s25 }
  0x30   :  { %p5733_p8 = por %p5732_p7, %p5731_p6 }
  0x32   :  { %p5734_p9 = pnand %p5733_p8, %p5727_p5 }
  0x34   :  { %5737 = shalt.err (!%p5734_p9)
}
  0x35   :  { %s5909_s3 = smov 256   ;;  %s5910_s19 = smov 16  }
  0x36   :  { %87 = dma.hbm_to_vmem [thread:$0]  %s6211_s5, 8192, %s82_s26, [#allocation12], %s5909_s3, %s5909_s3, %s5910_s19  }
  0x37   :  { %s5911_s27 = smov [#allocation14]   ;;  %s5738_s11 = scalar_lea.hbm %s6213_s7, 4096 }
  0x38   :  { %s103_s28 = sshll.u32 %s5911_s27, 4  ;;  %p5739_p10 = scmp.ne.s32.totalorder %s6213_s7, %s5738_s11  ;;  %s104_s28 = int_to_ptr.vmem [resolvable:$true] %s103_s28 }
  0x39   :  { %p5742_p11 = scmp.lt.u32.totalorder %s5738_s11, %s6213_s7 }
  0x3b   :  { %p5744_p12 = pnand %p5742_p11, %p5739_p10 }
  0x3d   :  { %5747 = shalt.err (!%p5744_p12)
}
  0x3e   :  { %s5748_s14 = scalar_lea.vmem %s104_s28, 4096  ;;  %p5753_p0 = scmp.lt.s32.totalorder %s104_s28, %s104_s28 }
  0x3f   :  { %p5749_p13 = scmp.ne.s32.totalorder %s104_s28, %s5748_s14  ;;  %p5754_p1 = scmp.lt.s32.totalorder %s5748_s14, %s5748_s14 }
  0x41   :  { %p5755_p2 = por %p5754_p1, %p5753_p0 }
  0x43   :  { %p5756_p3 = pnand %p5755_p2, %p5749_p13 }
  0x45   :  { %5759 = shalt.err (!%p5756_p3)
}
  0x46   :  { %s5912_s5 = smov 64   ;;  %s5913_s26 = smov 4  }
  0x47   :  { %109 = dma.hbm_to_vmem [thread:$0]  %s6213_s7, 4096, %s104_s28, [#allocation15], %s5912_s5, %s5912_s5, %s5913_s26  }
  0x48   :  { %s5914_s17 = smov [#allocation2]   ;;  %s5760_s23 = scalar_lea.hbm %s6206_s0, 3072 }
  0x49   :  { %s25_s18 = sshll.u32 %s5914_s17, 4  ;;  %p5761_p4 = scmp.ne.s32.totalorder %s6206_s0, %s5760_s23  ;;  %s26_s18 = int_to_ptr.vmem [resolvable:$true] %s25_s18 }
  0x4a   :  { %p5764_p5 = scmp.lt.u32.totalorder %s5760_s23, %s6206_s0 }
  0x4c   :  { %p5766_p6 = pnand %p5764_p5, %p5761_p4 }
  0x4e   :  { %5769 = shalt.err (!%p5766_p6)
}
  0x4f   :  { %s5770_s24 = scalar_lea.vmem %s26_s18, 3072  ;;  %p5775_p8 = scmp.lt.s32.totalorder %s26_s18, %s26_s18 }
  0x50   :  { %p5771_p7 = scmp.ne.s32.totalorder %s26_s18, %s5770_s24  ;;  %p5776_p9 = scmp.lt.s32.totalorder %s5770_s24, %s5770_s24 }
  0x52   :  { %p5777_p10 = por %p5776_p9, %p5775_p8 }
  0x54   :  { %p5778_p11 = pnand %p5777_p10, %p5771_p7 }
  0x56   :  { %5781 = shalt.err (!%p5778_p11)
}
  0x57   :  { %s5915_s7 = smov 1536   ;;  %s5916_s27 = smov 96  }
  0x58   :  { %31 = dma.hbm_to_vmem [thread:$0]  %s6206_s0, 3072, %s26_s18, [#allocation3], %s5915_s7, %s5915_s7, %s5916_s27  }
  0x59   :  { %s5917_s30 = smov [#allocation7]   ;;  %s5918_s12 = smov [#allocation10]  }
  0x5a   :  { %s50_s11 = sshll.u32 %s5917_s30, 4  ;;  %s72_s13 = sshll.u32 %s5918_s12, 4  ;;  %s51_s11 = int_to_ptr.vmem [resolvable:$true] %s50_s11  ;;  %s73_s13 = int_to_ptr.vmem [resolvable:$true] %s72_s13 }
  0x5b   :  { %s5782_s14 = scalar_lea.hbm %s6208_s2, 32 }
  0x5c   :  { %p5783_p12 = scmp.ne.s32.totalorder %s6208_s2, %s5782_s14  ;;  %p5786_p13 = scmp.lt.u32.totalorder %s5782_s14, %s6208_s2 }
  0x5e   :  { %p5788_p0 = pnand %p5786_p13, %p5783_p12 }
  0x60   :  { %5791 = shalt.err (!%p5788_p0)
}
  0x61   :  { %s5792_s0 = scalar_lea.vmem %s51_s11, 32  ;;  %p5797_p2 = scmp.lt.s32.totalorder %s51_s11, %s51_s11 }
  0x62   :  { %p5793_p1 = scmp.ne.s32.totalorder %s51_s11, %s5792_s0  ;;  %p5798_p3 = scmp.lt.s32.totalorder %s5792_s0, %s5792_s0 }
  0x64   :  { %p5799_p4 = por %p5798_p3, %p5797_p2 }
  0x66   :  { %p5800_p5 = pnand %p5799_p4, %p5793_p1 }
  0x68   :  { %5803 = shalt.err (!%p5800_p5)
}
  0x69   :  { %53 = dma.hbm_to_vmem [thread:$0]  %s6208_s2, 32, %s51_s11, [#allocation6]  }
  0x6a   :  { %s5804_s3 = scalar_lea.hbm %s6210_s4, 32 }
  0x6b   :  { %p5805_p6 = scmp.ne.s32.totalorder %s6210_s4, %s5804_s3  ;;  %p5808_p7 = scmp.lt.u32.totalorder %s5804_s3, %s6210_s4 }
  0x6d   :  { %p5810_p8 = pnand %p5808_p7, %p5805_p6 }
  0x6f   :  { %5813 = shalt.err (!%p5810_p8)
}
  0x70   :  { %s5814_s27 = scalar_lea.vmem %s73_s13, 32  ;;  %p5819_p10 = scmp.lt.s32.totalorder %s73_s13, %s73_s13 }
  0x71   :  { %p5815_p9 = scmp.ne.s32.totalorder %s73_s13, %s5814_s27  ;;  %p5820_p11 = scmp.lt.s32.totalorder %s5814_s27, %s5814_s27 }
  0x73   :  { %p5821_p12 = por %p5820_p11, %p5819_p10 }
  0x75   :  { %p5822_p13 = pnand %p5821_p12, %p5815_p9 }
  0x77   :  { %5825 = shalt.err (!%p5822_p13)
}
  0x78   :  { %75 = dma.hbm_to_vmem [thread:$0]  %s6210_s4, 32, %s73_s13, [#allocation9]  }
  0x79   :  { %s5919_s29 = smov [#allocation13]   ;;  %s5920_s11 = smov [#allocation16]  }
  0x7a   :  { %s94_s30 = sshll.u32 %s5919_s29, 4  ;;  %s116_s12 = sshll.u32 %s5920_s11, 4  ;;  %s95_s30 = int_to_ptr.vmem [resolvable:$true] %s94_s30  ;;  %s117_s12 = int_to_ptr.vmem [resolvable:$true] %s116_s12 }
  0x7b   :  { %s5826_s14 = scalar_lea.hbm %s6212_s6, 64 }
  0x7c   :  { %p5827_p0 = scmp.ne.s32.totalorder %s6212_s6, %s5826_s14  ;;  %p5830_p1 = scmp.lt.u32.totalorder %s5826_s14, %s6212_s6 }
  0x7e   :  { %p5832_p2 = pnand %p5830_p1, %p5827_p0 }
  0x80   :  { %5835 = shalt.err (!%p5832_p2)
}
  0x81   :  { %s5836_s4 = scalar_lea.vmem %s95_s30, 64  ;;  %p5841_p4 = scmp.lt.s32.totalorder %s95_s30, %s95_s30 }
  0x82   :  { %p5837_p3 = scmp.ne.s32.totalorder %s95_s30, %s5836_s4  ;;  %p5842_p5 = scmp.lt.s32.totalorder %s5836_s4, %s5836_s4 }
  0x84   :  { %p5843_p6 = por %p5842_p5, %p5841_p4 }
  0x86   :  { %p5844_p7 = pnand %p5843_p6, %p5837_p3 }
  0x88   :  { %5847 = shalt.err (!%p5844_p7)
}
  0x89   :  { %97 = dma.hbm_to_vmem [thread:$0]  %s6212_s6, 64, %s95_s30, [#allocation12]  }
  0x8a   :  { %s5848_s23 = scalar_lea.hbm %s6214_s8, 16 }
  0x8b   :  { %p5849_p8 = scmp.ne.s32.totalorder %s6214_s8, %s5848_s23  ;;  %p5852_p9 = scmp.lt.u32.totalorder %s5848_s23, %s6214_s8 }
  0x8d   :  { %p5854_p10 = pnand %p5852_p9, %p5849_p8 }
  0x8f   :  { %5857 = shalt.err (!%p5854_p10)
}
  0x90   :  { %s5858_s24 = scalar_lea.vmem %s117_s12, 16  ;;  %s5862_s7 = scalar_lea.vmem %s117_s12, 32 }
  0x91   :  { %p5859_p11 = scmp.ne.s32.totalorder %s117_s12, %s5858_s24  ;;  %p5863_p12 = scmp.lt.s32.totalorder %s117_s12, %s117_s12 }
  0x92   :  { %p5864_p13 = scmp.lt.s32.totalorder %s5862_s7, %s5858_s24 }
  0x94   :  { %p5865_p0 = por %p5864_p13, %p5863_p12 }
  0x96   :  { %p5866_p1 = pnand %p5865_p0, %p5859_p11 }
  0x98   :  { %5869 = shalt.err (!%p5866_p1)
}
  0x99   :  { %119 = dma.hbm_to_vmem [thread:$0]  %s6214_s8, 16, %s117_s12, [#allocation15]  }
  0x9a   :  { %5892 = dma.done.wait [#allocation3], 3072  }
  0x9b   :  { %5893 = vsyncadd [#allocation3], 4294964224 }
  0x9c   :  { %5894 = dma.done.wait [#allocation6], 49184  }
  0x9d   :  { %5895 = vsyncadd [#allocation6], 4294918112 }
  0x9e   :  { %5896 = dma.done.wait [#allocation9], 4128  }
  0x9f   :  { %5897 = vsyncadd [#allocation9], 4294963168 }
  0xa0   :  { %5898 = dma.done.wait [#allocation12], 8256  }
  0xa1   :  { %5899 = vsyncadd [#allocation12], 4294959040 }
  0xa2   :  { %5900 = dma.done.wait [#allocation15], 4112  }
  0xa3   :  { %5901 = vsyncadd [#allocation15], 4294963184  ;;  %v4920_v0 = vld [vmem:[#allocation5 + $0x404] ss:$8 sps:$4 sm:$0xff]   ;;  %v4922_v1 = vld [vmem:[#allocation5 + $0x400] ss:$8 sps:$4 sm:$0xff]  }
  0xa4   :  { %2781 = vmatprep.subr.bf16.mxu0 %v4920_v0  ;;  %v4923_v2 = vld [vmem:[#allocation5 + $0x414] ss:$8 sps:$4 sm:$0xff]   ;;  %v4925_v3 = vld [vmem:[#allocation5 + $0x410] ss:$8 sps:$4 sm:$0xff]   ;;  %v4926_v4 = vld [vmem:[#allocation5 + $0x424] ss:$8 sps:$4 sm:$0xff]  }
  0xa5   :  { %2782 = vmatpush1.bf16.msra.mxu0 %v4922_v1  ;;  %v4928_v5 = vld [vmem:[#allocation5 + $0x420] ss:$8 sps:$4 sm:$0xff]   ;;  %v4929_v6 = vld [vmem:[#allocation5 + $0x434] ss:$8 sps:$4 sm:$0xff]   ;;  %v4931_v7 = vld [vmem:[#allocation5 + $0x430] ss:$8 sps:$4 sm:$0xff]  }
  0xa6   :  { %2783 = vmatprep.subr.bf16.mxu0 %v4923_v2  ;;  %v4932_v8 = vld [vmem:[#allocation5 + $0x444] ss:$8 sps:$4 sm:$0xff]   ;;  %v4934_v9 = vld [vmem:[#allocation5 + $0x440] ss:$8 sps:$4 sm:$0xff]   ;;  %v4935_v10 = vld [vmem:[#allocation5 + $0x454] ss:$8 sps:$4 sm:$0xff]  }
  0xa7   :  { %v4937_v11 = vld [vmem:[#allocation5 + $0x450] ss:$8 sps:$4 sm:$0xff]   ;;  %v4938_v12 = vld [vmem:[#allocation5 + $0x464] ss:$8 sps:$4 sm:$0xff]   ;;  %v4940_v14 = vld [vmem:[#allocation5 + $0x460] ss:$8 sps:$4 sm:$0xff]  }
  0xa8   :  { %v4965_v13 = vld [vmem:[#allocation5 + $0x4] ss:$8 sps:$4 sm:$0xff]   ;;  %v4941_v15 = vld [vmem:[#allocation5 + $0x474] ss:$8 sps:$4 sm:$0xff]   ;;  %v4969_v16 = vld [vmem:[#allocation5] ss:$8 sps:$4 sm:$0xff]  }
  0xa9   :  { %2784 = vmatpush1.bf16.msra.mxu0 %v4925_v3  ;;  %2609 = vmatprep.subr.bf16.mxu1 %v4965_v13  ;;  %v4971_v17 = vld [vmem:[#allocation5 + $0x14] ss:$8 sps:$4 sm:$0xff]   ;;  %v6083_v18 = vld [vmem:[#allocation2 + $0x20] sm:$0xff]  ;;  %v4976_v21 = vld [vmem:[#allocation5 + $0x10] ss:$8 sps:$4 sm:$0xff]   ;;  %s5921_s8 = smov [#allocation17]  }
  0xaa   :  { %2785 = vmatprep.subr.bf16.mxu0 %v4926_v4  ;;  %2610 = vmatpush1.bf16.msra.mxu1 %v4969_v16  ;;  %v6085_v19 = vld [vmem:[#allocation2 + $0x80] sm:$0xff]  ;;  %v4943_v23 = vld [vmem:[#allocation5 + $0x470] ss:$8 sps:$4 sm:$0xff]   ;;  %v4983_v26 = vld [vmem:[#allocation5 + $0x34] ss:$8 sps:$4 sm:$0xff]   ;;  %s4248_s2 = sshll.u32 %s5921_s8, 4  ;;  %s4249_s2 = int_to_ptr.vmem [resolvable:$true] %s4248_s2 }
  0xab   :  { %2611 = vmatprep.subr.bf16.mxu1 %v4971_v17  ;;  %v4273_v20 = vcombine.high %v6083_v18, %v6085_v19  ;;  %v4977_v22 = vld [vmem:[#allocation5 + $0x24] ss:$8 sps:$4 sm:$0xff]   ;;  %v4982_v25 = vld [vmem:[#allocation5 + $0x20] ss:$8 sps:$4 sm:$0xff]   ;;  %v4947_v28 = vld [vmem:[#allocation5 + $0x494] ss:$8 sps:$4 sm:$0xff]   ;;  %v4272_v59 = vcombine.low %v6083_v18, %v6085_v19  ;;  %p5875_p3 = scmp.lt.s32.totalorder %s4249_s2, %s4249_s2 }
  0xac   :  { %v4944_v24 = vld [vmem:[#allocation5 + $0x484] ss:$8 sps:$4 sm:$0xff]   ;;  %v4946_v27 = vld [vmem:[#allocation5 + $0x480] ss:$8 sps:$4 sm:$0xff]   ;;  %v4988_v29 = vld [vmem:[#allocation5 + $0x30] ss:$8 sps:$4 sm:$0xff]  }
  0xad   :  { %2786 = vmatpush1.bf16.msra.mxu0 %v4928_v5  ;;  %2813 = vmatprep.mubr.bf16.mxu0 %v4273_v20  ;;  %v4989_v30 = vld [vmem:[#allocation5 + $0x44] ss:$8 sps:$4 sm:$0xff]   ;;  %v4949_v31 = vld [vmem:[#allocation5 + $0x490] ss:$8 sps:$4 sm:$0xff]   ;;  %v4994_v33 = vld [vmem:[#allocation5 + $0x40] ss:$8 sps:$4 sm:$0xff]  }
  0xae   :  { %2787 = vmatprep.subr.bf16.mxu0 %v4929_v6  ;;  %2612 = vmatpush1.bf16.msra.mxu1 %v4976_v21  ;;  %v4950_v32 = vld [vmem:[#allocation5 + $0x4a4] ss:$8 sps:$4 sm:$0xff]   ;;  %v4995_v34 = vld [vmem:[#allocation5 + $0x54] ss:$8 sps:$4 sm:$0xff]   ;;  %v4952_v35 = vld [vmem:[#allocation5 + $0x4a0] ss:$8 sps:$4 sm:$0xff]  }
  0xaf   :  { %2613 = vmatprep.subr.bf16.mxu1 %v4977_v22  ;;  %v4953_v36 = vld [vmem:[#allocation5 + $0x4b4] ss:$8 sps:$4 sm:$0xff]   ;;  %v5000_v37 = vld [vmem:[#allocation5 + $0x50] ss:$8 sps:$4 sm:$0xff]   ;;  %v5001_v38 = vld [vmem:[#allocation5 + $0x64] ss:$8 sps:$4 sm:$0xff]  }
  0xb0   :  { %v4955_v39 = vld [vmem:[#allocation5 + $0x4b0] ss:$8 sps:$4 sm:$0xff]   ;;  %v4956_v40 = vld [vmem:[#allocation5 + $0x4c4] ss:$8 sps:$4 sm:$0xff]   ;;  %v5006_v41 = vld [vmem:[#allocation5 + $0x60] ss:$8 sps:$4 sm:$0xff]  }
  0xb1   :  { %2788 = vmatpush1.bf16.msra.mxu0 %v4931_v7  ;;  %v5007_v42 = vld [vmem:[#allocation5 + $0x74] ss:$8 sps:$4 sm:$0xff]   ;;  %v4958_v43 = vld [vmem:[#allocation5 + $0x4c0] ss:$8 sps:$4 sm:$0xff]   ;;  %v5012_v45 = vld [vmem:[#allocation5 + $0x70] ss:$8 sps:$4 sm:$0xff]  }
  0xb2   :  { %2789 = vmatprep.subr.bf16.mxu0 %v4932_v8  ;;  %2614 = vmatpush1.bf16.msra.mxu1 %v4982_v25  ;;  %v4959_v44 = vld [vmem:[#allocation5 + $0x4d4] ss:$8 sps:$4 sm:$0xff]   ;;  %v5013_v46 = vld [vmem:[#allocation5 + $0x84] ss:$8 sps:$4 sm:$0xff]   ;;  %v4961_v47 = vld [vmem:[#allocation5 + $0x4d0] ss:$8 sps:$4 sm:$0xff]  }
  0xb3   :  { %2615 = vmatprep.subr.bf16.mxu1 %v4983_v26  ;;  %v4962_v48 = vld [vmem:[#allocation5 + $0x4e4] ss:$8 sps:$4 sm:$0xff]   ;;  %v5018_v49 = vld [vmem:[#allocation5 + $0x80] ss:$8 sps:$4 sm:$0xff]   ;;  %v5019_v50 = vld [vmem:[#allocation5 + $0x94] ss:$8 sps:$4 sm:$0xff]  }
  0xb4   :  { %v4964_v51 = vld [vmem:[#allocation5 + $0x4e0] ss:$8 sps:$4 sm:$0xff]   ;;  %v4967_v52 = vld [vmem:[#allocation5 + $0x4f4] ss:$8 sps:$4 sm:$0xff]   ;;  %v5024_v53 = vld [vmem:[#allocation5 + $0x90] ss:$8 sps:$4 sm:$0xff]  }
  0xb5   :  { %2790 = vmatpush1.bf16.msra.mxu0 %v4934_v9  ;;  %v5025_v54 = vld [vmem:[#allocation5 + $0xa4] ss:$8 sps:$4 sm:$0xff]   ;;  %v4970_v55 = vld [vmem:[#allocation5 + $0x4f0] ss:$8 sps:$4 sm:$0xff]   ;;  %v5030_v57 = vld [vmem:[#allocation5 + $0xa0] ss:$8 sps:$4 sm:$0xff]  }
  0xb6   :  { %2791 = vmatprep.subr.bf16.mxu0 %v4935_v10  ;;  %2616 = vmatpush1.bf16.msra.mxu1 %v4988_v29  ;;  %v4975_v56 = vld [vmem:[#allocation5 + $0x504] ss:$8 sps:$4 sm:$0xff]   ;;  %v5031_v58 = vld [vmem:[#allocation5 + $0xb4] ss:$8 sps:$4 sm:$0xff]   ;;  %v4973_v60 = vld [vmem:[#allocation5 + $0x500] ss:$8 sps:$4 sm:$0xff]  }
  0xb7   :  { %2617 = vmatprep.subr.bf16.mxu1 %v4989_v30  ;;  %v4981_v61 = vld [vmem:[#allocation5 + $0x514] ss:$8 sps:$4 sm:$0xff]   ;;  %v149_v62 = vld [vmem:[#allocation2] sm:$0xff]  ;;  %v5036_v0 = vld [vmem:[#allocation5 + $0xb0] ss:$8 sps:$4 sm:$0xff]   ;;  %s5870_s28 = scalar_lea.vmem %s4249_s2, 128 }
  0xb8   :  { %v161_v63 = vld [vmem:[#allocation2 + $0x60] sm:$0xff]  ;;  %v4979_v3 = vld [vmem:[#allocation5 + $0x510] ss:$8 sps:$4 sm:$0xff]   ;;  %v6091_v6 = vld [vmem:[#allocation2 + $0x28] sm:$0xff]  ;;  %p5871_p2 = scmp.ne.s32.totalorder %s4249_s2, %s5870_s28  ;;  %p5876_p4 = scmp.lt.s32.totalorder %s5870_s28, %s5870_s28 }
  0xb9   :  { %2792 = vmatpush1.bf16.msra.mxu0 %v4937_v11  ;;  %v4265_v1 = vcombine.high %v149_v62, %v161_v63  ;;  %v5037_v2 = vld [vmem:[#allocation5 + $0xc4] ss:$8 sps:$4 sm:$0xff]   ;;  %v5042_v5 = vld [vmem:[#allocation5 + $0xc0] ss:$8 sps:$4 sm:$0xff]   ;;  %v5043_v8 = vld [vmem:[#allocation5 + $0xd4] ss:$8 sps:$4 sm:$0xff]  }
  0xba   :  { %2793 = vmatprep.subr.bf16.mxu0 %v4938_v12  ;;  %2618 = vmatpush1.bf16.msra.mxu1 %v4994_v33  ;;  %v4987_v4 = vld [vmem:[#allocation5 + $0x524] ss:$8 sps:$4 sm:$0xff]   ;;  %v4985_v10 = vld [vmem:[#allocation5 + $0x520] ss:$8 sps:$4 sm:$0xff]   ;;  %v4993_v11 = vld [vmem:[#allocation5 + $0x534] ss:$8 sps:$4 sm:$0xff]   ;;  %p5877_p5 = por %p5876_p4, %p5875_p3 }
  0xbb   :  { %2619 = vmatprep.subr.bf16.mxu1 %v4995_v34  ;;  %2641 = vmatprep.mubr.bf16.mxu1 %v4265_v1  ;;  %v6093_v7 = vld [vmem:[#allocation2 + $0x88] sm:$0xff]  ;;  %v5048_v12 = vld [vmem:[#allocation5 + $0xd0] ss:$8 sps:$4 sm:$0xff]   ;;  %v5055_v17 = vld [vmem:[#allocation5 + $0xf4] ss:$8 sps:$4 sm:$0xff]  }
  0xbc   :  { %v4275_v9 = vcombine.high %v6091_v6, %v6093_v7  ;;  %v5049_v13 = vld [vmem:[#allocation5 + $0xe4] ss:$8 sps:$4 sm:$0xff]   ;;  %v5054_v16 = vld [vmem:[#allocation5 + $0xe0] ss:$8 sps:$4 sm:$0xff]   ;;  %v5005_v19 = vld [vmem:[#allocation5 + $0x554] ss:$8 sps:$4 sm:$0xff]   ;;  %p5878_p6 = pnand %p5877_p5, %p5871_p2 }
  0xbd   :  { %2794 = vmatpush1.bf16.msra.mxu0 %v4940_v14  ;;  %v4991_v14 = vld [vmem:[#allocation5 + $0x530] ss:$8 sps:$4 sm:$0xff]   ;;  %v4997_v18 = vld [vmem:[#allocation5 + $0x540] ss:$8 sps:$4 sm:$0xff]   ;;  %v5063_v21 = vld [vmem:[#allocation5 + $0x104] ss:$8 sps:$4 sm:$0xff]  }
  0xbe   :  { %2795 = vmatprep.subr.bf16.mxu0 %v4941_v15  ;;  %2620 = vmatpush1.bf16.msra.mxu1 %v5000_v37  ;;  %v4999_v15 = vld [vmem:[#allocation5 + $0x544] ss:$8 sps:$4 sm:$0xff]   ;;  %v5060_v20 = vld [vmem:[#allocation5 + $0xf0] ss:$8 sps:$4 sm:$0xff]   ;;  %v5061_v25 = vld [vmem:[#allocation5 + $0x100] ss:$8 sps:$4 sm:$0xff]  }
  0xbf   :  { %2621 = vmatprep.subr.bf16.mxu1 %v5001_v38  ;;  %v5003_v22 = vld [vmem:[#allocation5 + $0x550] ss:$8 sps:$4 sm:$0xff]   ;;  %v5069_v26 = vld [vmem:[#allocation5 + $0x114] ss:$8 sps:$4 sm:$0xff]   ;;  %v5075_v30 = vld [vmem:[#allocation5 + $0x124] ss:$8 sps:$4 sm:$0xff]  }
  0xc0   :  { %v5067_v29 = vld [vmem:[#allocation5 + $0x110] ss:$8 sps:$4 sm:$0xff]   ;;  %v5073_v33 = vld [vmem:[#allocation5 + $0x120] ss:$8 sps:$4 sm:$0xff]   ;;  %v5081_v34 = vld [vmem:[#allocation5 + $0x134] ss:$8 sps:$4 sm:$0xff]  }
  0xc1   :  { %2796 = vmatpush1.bf16.msra.mxu0 %v4943_v23  ;;  %v4264_v23 = vcombine.low %v149_v62, %v161_v63  ;;  %v5079_v37 = vld [vmem:[#allocation5 + $0x130] ss:$8 sps:$4 sm:$0xff]   ;;  %v5087_v38 = vld [vmem:[#allocation5 + $0x144] ss:$8 sps:$4 sm:$0xff]   ;;  %v5057_v62 = vld [vmem:[#allocation5 + $0x5e0] ss:$8 sps:$4 sm:$0xff]  }
  0xc2   :  { %2797 = vmatprep.subr.bf16.mxu0 %v4944_v24  ;;  %2622 = vmatpush1.bf16.msra.mxu1 %v5006_v41  ;;  %v5011_v24 = vld [vmem:[#allocation5 + $0x564] ss:$8 sps:$4 sm:$0xff]   ;;  %v5085_v41 = vld [vmem:[#allocation5 + $0x140] ss:$8 sps:$4 sm:$0xff]   ;;  %v5066_v63 = vld [vmem:[#allocation5 + $0x5f4] ss:$8 sps:$4 sm:$0xff]  }
  0xc3   :  { %2623 = vmatprep.subr.bf16.mxu1 %v5007_v42  ;;  %v5093_v42 = vld [vmem:[#allocation5 + $0x154] ss:$8 sps:$4 sm:$0xff]   ;;  %v5064_v1 = vld [vmem:[#allocation5 + $0x5f0] ss:$8 sps:$4 sm:$0xff]  }
  0xc5   :  { %2798 = vmatpush1.bf16.msra.mxu0 %v4946_v27  ;;  %v5009_v27 = vld [vmem:[#allocation5 + $0x560] ss:$8 sps:$4 sm:$0xff]  }
  0xc6   :  { %2799 = vmatprep.subr.bf16.mxu0 %v4947_v28  ;;  %2624 = vmatpush1.bf16.msra.mxu1 %v5012_v45  ;;  %v5017_v28 = vld [vmem:[#allocation5 + $0x574] ss:$8 sps:$4 sm:$0xff]   ;;  %v5091_v45 = vld [vmem:[#allocation5 + $0x150] ss:$8 sps:$4 sm:$0xff]  }
  0xc7   :  { %2625 = vmatprep.subr.bf16.mxu1 %v5013_v46  ;;  %v5099_v46 = vld [vmem:[#allocation5 + $0x164] ss:$8 sps:$4 sm:$0xff]  }
  0xc9   :  { %2800 = vmatpush1.bf16.msra.mxu0 %v4949_v31  ;;  %v5015_v31 = vld [vmem:[#allocation5 + $0x570] ss:$8 sps:$4 sm:$0xff]  }
  0xca   :  { %2801 = vmatprep.subr.bf16.mxu0 %v4950_v32  ;;  %2626 = vmatpush1.bf16.msra.mxu1 %v5018_v49  ;;  %v5023_v32 = vld [vmem:[#allocation5 + $0x584] ss:$8 sps:$4 sm:$0xff]  }
  0xcb   :  { %2627 = vmatprep.subr.bf16.mxu1 %v5019_v50  ;;  %v6097_v49 = vld [vmem:[#allocation2 + $0x8] sm:$0xff] }
  0xcc   :  { %v6099_v50 = vld [vmem:[#allocation2 + $0x68] sm:$0xff] }
  0xcd   :  { %2802 = vmatpush1.bf16.msra.mxu0 %v4952_v35  ;;  %v5021_v35 = vld [vmem:[#allocation5 + $0x580] ss:$8 sps:$4 sm:$0xff]  }
  0xce   :  { %2803 = vmatprep.subr.bf16.mxu0 %v4953_v36  ;;  %2628 = vmatpush1.bf16.msra.mxu1 %v5024_v53  ;;  %v5029_v36 = vld [vmem:[#allocation5 + $0x594] ss:$8 sps:$4 sm:$0xff]  }
  0xcf   :  { %2629 = vmatprep.subr.bf16.mxu1 %v5025_v54  ;;  %v5105_v53 = vld [vmem:[#allocation5 + $0x174] ss:$8 sps:$4 sm:$0xff]   ;;  %v5045_v54 = vld [vmem:[#allocation5 + $0x5c0] ss:$8 sps:$4 sm:$0xff]  }
  0xd1   :  { %2804 = vmatpush1.bf16.msra.mxu0 %v4955_v39  ;;  %v5027_v39 = vld [vmem:[#allocation5 + $0x590] ss:$8 sps:$4 sm:$0xff]  }
  0xd2   :  { %2805 = vmatprep.subr.bf16.mxu0 %v4956_v40  ;;  %2630 = vmatpush1.bf16.msra.mxu1 %v5030_v57  ;;  %v5035_v40 = vld [vmem:[#allocation5 + $0x5a4] ss:$8 sps:$4 sm:$0xff]  }
  0xd3   :  { %2631 = vmatprep.subr.bf16.mxu1 %v5031_v58  ;;  %v5111_v57 = vld [vmem:[#allocation5 + $0x184] ss:$8 sps:$4 sm:$0xff]   ;;  %v5051_v58 = vld [vmem:[#allocation5 + $0x5d0] ss:$8 sps:$4 sm:$0xff]  }
  0xd5   :  { %2806 = vmatpush1.bf16.msra.mxu0 %v4958_v43  ;;  %v5033_v43 = vld [vmem:[#allocation5 + $0x5a0] ss:$8 sps:$4 sm:$0xff]  }
  0xd6   :  { %2807 = vmatprep.subr.bf16.mxu0 %v4959_v44  ;;  %2632 = vmatpush1.bf16.msra.mxu1 %v5036_v0  ;;  %v5041_v44 = vld [vmem:[#allocation5 + $0x5b4] ss:$8 sps:$4 sm:$0xff]   ;;  %v5115_v0 = vld [vmem:[#allocation5 + $0x190] ss:$8 sps:$4 sm:$0xff]  }
  0xd7   :  { %2633 = vmatprep.subr.bf16.mxu1 %v5037_v2  ;;  %v5123_v2 = vld [vmem:[#allocation5 + $0x1a4] ss:$8 sps:$4 sm:$0xff]  }
  0xd9   :  { %2808 = vmatpush1.bf16.msra.mxu0 %v4961_v47  ;;  %v5039_v47 = vld [vmem:[#allocation5 + $0x5b0] ss:$8 sps:$4 sm:$0xff]  }
  0xda   :  { %2809 = vmatprep.subr.bf16.mxu0 %v4962_v48  ;;  %2634 = vmatpush1.bf16.msra.mxu1 %v5042_v5  ;;  %v5047_v48 = vld [vmem:[#allocation5 + $0x5c4] ss:$8 sps:$4 sm:$0xff]   ;;  %v6103_v5 = vld [vmem:[#allocation2 + $0x30] sm:$0xff] }
  0xdb   :  { %2635 = vmatprep.subr.bf16.mxu1 %v5043_v8  ;;  %v6105_v8 = vld [vmem:[#allocation2 + $0x90] sm:$0xff] }
  0xdd   :  { %2810 = vmatpush1.bf16.msra.mxu0 %v4964_v51  ;;  %v5097_v51 = vld [vmem:[#allocation5 + $0x160] ss:$8 sps:$4 sm:$0xff]  }
  0xde   :  { %2811 = vmatprep.subr.bf16.mxu0 %v4967_v52  ;;  %2636 = vmatpush1.bf16.msra.mxu1 %v5048_v12  ;;  %v4267_v52 = vcombine.high %v6097_v49, %v6099_v50  ;;  %v4277_v12 = vcombine.high %v6103_v5, %v6105_v8 }
  0xdf   :  { %2637 = vmatprep.subr.bf16.mxu1 %v5049_v13  ;;  %v5078_v13 = vld [vmem:[#allocation5 + $0x614] ss:$8 sps:$4 sm:$0xff]  }
  0xe1   :  { %2812 = vmatpush1.bf16.msra.mxu0 %v4970_v55  ;;  %v5053_v55 = vld [vmem:[#allocation5 + $0x5d4] ss:$8 sps:$4 sm:$0xff]  }
  0xe2   :  { %2824 = vmatprep.subr.bf16.mxu0 %v4975_v56  ;;  %2638 = vmatpush1.bf16.msra.mxu1 %v5054_v16  ;;  %v5103_v56 = vld [vmem:[#allocation5 + $0x170] ss:$8 sps:$4 sm:$0xff]  }
  0xe3   :  { %2639 = vmatprep.subr.bf16.mxu1 %v5055_v17  ;;  %v5076_v16 = vld [vmem:[#allocation5 + $0x610] ss:$8 sps:$4 sm:$0xff]   ;;  %v5084_v17 = vld [vmem:[#allocation5 + $0x624] ss:$8 sps:$4 sm:$0xff]  }
  0xe4   :  { %2814 = vmatmul.mubr.bf16.vlgmr.msra.gmra.mrb[0].mxu0 %v4272_v59  ;;  %v5059_v59 = vld [vmem:[#allocation5 + $0x5e4] ss:$8 sps:$4 sm:$0xff]  }
  0xe5   :  { %2825 = vmatpush1.bf16.msra.mxu0 %v4973_v60  ;;  %2856 = vmatprep.mubr.bf16.mxu0 %v4275_v9  ;;  %v5109_v60 = vld [vmem:[#allocation5 + $0x180] ss:$8 sps:$4 sm:$0xff]   ;;  %v5129_v9 = vld [vmem:[#allocation5 + $0x1b4] ss:$8 sps:$4 sm:$0xff]  }
  0xe6   :  { %2826 = vmatprep.subr.bf16.mxu0 %v4981_v61  ;;  %2640 = vmatpush1.bf16.msra.mxu1 %v5060_v20  ;;  %v5117_v61 = vld [vmem:[#allocation5 + $0x194] ss:$8 sps:$4 sm:$0xff]   ;;  %v5139_v20 = vld [vmem:[#allocation5 + $0x1d0] ss:$8 sps:$4 sm:$0xff]  }
  0xe7   :  { %2652 = vmatprep.subr.bf16.mxu1 %v5063_v21  ;;  %v5147_v21 = vld [vmem:[#allocation5 + $0x1e4] ss:$8 sps:$4 sm:$0xff]  }
  0xe9   :  { %2827 = vmatpush1.bf16.msra.mxu0 %v4979_v3  ;;  %2642 = vmatmul.mubr.bf16.vlgmr.msra.gmra.mrb[0].mxu1 %v4264_v23  ;;  %v5072_v3 = vld [vmem:[#allocation5 + $0x604] ss:$8 sps:$4 sm:$0xff]  }
  0xea   :  { %2828 = vmatprep.subr.bf16.mxu0 %v4987_v4  ;;  %2653 = vmatpush1.bf16.msra.mxu1 %v5061_v25  ;;  %v5121_v4 = vld [vmem:[#allocation5 + $0x1a0] ss:$8 sps:$4 sm:$0xff]   ;;  %v5096_v23 = vld [vmem:[#allocation5 + $0x644] ss:$8 sps:$4 sm:$0xff]   ;;  %v5153_v25 = vld [vmem:[#allocation5 + $0x1f4] ss:$8 sps:$4 sm:$0xff]  }
  0xeb   :  { %2654 = vmatprep.subr.bf16.mxu1 %v5069_v26  ;;  %2684 = vmatprep.mubr.bf16.mxu1 %v4267_v52  ;;  %v5094_v26 = vld [vmem:[#allocation5 + $0x640] ss:$8 sps:$4 sm:$0xff]  }
  0xec   :  { %v5181_v52 = vld [vmem:[#allocation5 + $0x240] ss:$8 sps:$4 sm:$0xff]  }
  0xed   :  { %2829 = vmatpush1.bf16.msra.mxu0 %v4985_v10  ;;  %v4274_v10 = vcombine.low %v6091_v6, %v6093_v7  ;;  %v5141_v6 = vld [vmem:[#allocation5 + $0x1d4] ss:$8 sps:$4 sm:$0xff]   ;;  %v5082_v7 = vld [vmem:[#allocation5 + $0x620] ss:$8 sps:$4 sm:$0xff]  }
  0xee   :  { %2830 = vmatprep.subr.bf16.mxu0 %v4993_v11  ;;  %2655 = vmatpush1.bf16.msra.mxu1 %v5067_v29  ;;  %v5070_v11 = vld [vmem:[#allocation5 + $0x600] ss:$8 sps:$4 sm:$0xff]   ;;  %v5159_v29 = vld [vmem:[#allocation5 + $0x204] ss:$8 sps:$4 sm:$0xff]  }
  0xef   :  { %2656 = vmatprep.subr.bf16.mxu1 %v5075_v30  ;;  %v5100_v30 = vld [vmem:[#allocation5 + $0x650] ss:$8 sps:$4 sm:$0xff]  }
  0xf1   :  { %2831 = vmatpush1.bf16.msra.mxu0 %v4991_v14  ;;  %v5127_v14 = vld [vmem:[#allocation5 + $0x1b0] ss:$8 sps:$4 sm:$0xff]  }
  0xf2   :  { %2832 = vmatprep.subr.bf16.mxu0 %v4999_v15  ;;  %2657 = vmatpush1.bf16.msra.mxu1 %v5073_v33  ;;  %v5135_v15 = vld [vmem:[#allocation5 + $0x1c4] ss:$8 sps:$4 sm:$0xff]   ;;  %v5157_v33 = vld [vmem:[#allocation5 + $0x200] ss:$8 sps:$4 sm:$0xff]  }
  0xf3   :  { %2658 = vmatprep.subr.bf16.mxu1 %v5081_v34  ;;  %v5165_v34 = vld [vmem:[#allocation5 + $0x214] ss:$8 sps:$4 sm:$0xff]  }
  0xf5   :  { %2833 = vmatpush1.bf16.msra.mxu0 %v4997_v18  ;;  %v5133_v18 = vld [vmem:[#allocation5 + $0x1c0] ss:$8 sps:$4 sm:$0xff]  }
  0xf6   :  { %2834 = vmatprep.subr.bf16.mxu0 %v5005_v19  ;;  %2659 = vmatpush1.bf16.msra.mxu1 %v5079_v37  ;;  %v5090_v19 = vld [vmem:[#allocation5 + $0x634] ss:$8 sps:$4 sm:$0xff]  }
  0xf7   :  { %2660 = vmatprep.subr.bf16.mxu1 %v5087_v38  ;;  %v6113_v37 = vld [vmem:[#allocation2 + $0x10] sm:$0xff] }
  0xf8   :  { %v6115_v38 = vld [vmem:[#allocation2 + $0x70] sm:$0xff] }
  0xf9   :  { %2835 = vmatpush1.bf16.msra.mxu0 %v5003_v22  ;;  %v5088_v22 = vld [vmem:[#allocation5 + $0x630] ss:$8 sps:$4 sm:$0xff]  }
  0xfa   :  { %2836 = vmatprep.subr.bf16.mxu0 %v5011_v24  ;;  %2661 = vmatpush1.bf16.msra.mxu1 %v5085_v41  ;;  %v5145_v24 = vld [vmem:[#allocation5 + $0x1e0] ss:$8 sps:$4 sm:$0xff]   ;;  %v5171_v41 = vld [vmem:[#allocation5 + $0x224] ss:$8 sps:$4 sm:$0xff]  }
  0xfb   :  { %2662 = vmatprep.subr.bf16.mxu1 %v5093_v42  ;;  %v5112_v42 = vld [vmem:[#allocation5 + $0x670] ss:$8 sps:$4 sm:$0xff]  }
  0xfd   :  { %2837 = vmatpush1.bf16.msra.mxu0 %v5009_v27  ;;  %v5102_v27 = vld [vmem:[#allocation5 + $0x654] ss:$8 sps:$4 sm:$0xff]  }
  0xfe   :  { %2838 = vmatprep.subr.bf16.mxu0 %v5017_v28  ;;  %2663 = vmatpush1.bf16.msra.mxu1 %v5091_v45  ;;  %v5151_v28 = vld [vmem:[#allocation5 + $0x1f0] ss:$8 sps:$4 sm:$0xff]   ;;  %v5177_v45 = vld [vmem:[#allocation5 + $0x234] ss:$8 sps:$4 sm:$0xff]  }
  0xff   :  { %2664 = vmatprep.subr.bf16.mxu1 %v5099_v46  ;;  %v5118_v46 = vld [vmem:[#allocation5 + $0x680] ss:$8 sps:$4 sm:$0xff]  }
 0x101   :  { %2839 = vmatpush1.bf16.msra.mxu0 %v5015_v31  ;;  %v4266_v31 = vcombine.low %v6097_v49, %v6099_v50  ;;  %v5183_v49 = vld [vmem:[#allocation5 + $0x244] ss:$8 sps:$4 sm:$0xff]   ;;  %v5124_v50 = vld [vmem:[#allocation5 + $0x690] ss:$8 sps:$4 sm:$0xff]  }
 0x102   :  { %2840 = vmatprep.subr.bf16.mxu0 %v5023_v32  ;;  %2665 = vmatpush1.bf16.msra.mxu1 %v5097_v51  ;;  %v5108_v32 = vld [vmem:[#allocation5 + $0x664] ss:$8 sps:$4 sm:$0xff]  }
 0x103   :  { %2666 = vmatprep.subr.bf16.mxu1 %v5105_v53  ;;  %v5132_v51 = vld [vmem:[#allocation5 + $0x6a4] ss:$8 sps:$4 sm:$0xff]   ;;  %v5189_v53 = vld [vmem:[#allocation5 + $0x254] ss:$8 sps:$4 sm:$0xff]  }
 0x105   :  { %2841 = vmatpush1.bf16.msra.mxu0 %v5021_v35  ;;  %v5106_v35 = vld [vmem:[#allocation5 + $0x660] ss:$8 sps:$4 sm:$0xff]  }
 0x106   :  { %2842 = vmatprep.subr.bf16.mxu0 %v5029_v36  ;;  %2667 = vmatpush1.bf16.msra.mxu1 %v5103_v56  ;;  %v5114_v36 = vld [vmem:[#allocation5 + $0x674] ss:$8 sps:$4 sm:$0xff]   ;;  %v5187_v56 = vld [vmem:[#allocation5 + $0x250] ss:$8 sps:$4 sm:$0xff]  }
 0x107   :  { %2668 = vmatprep.subr.bf16.mxu1 %v5111_v57  ;;  %v5195_v57 = vld [vmem:[#allocation5 + $0x264] ss:$8 sps:$4 sm:$0xff]  }
 0x109   :  { %2843 = vmatpush1.bf16.msra.mxu0 %v5027_v39  ;;  %v5163_v39 = vld [vmem:[#allocation5 + $0x210] ss:$8 sps:$4 sm:$0xff]  }
 0x10a   :  { %2844 = vmatprep.subr.bf16.mxu0 %v5035_v40  ;;  %2669 = vmatpush1.bf16.msra.mxu1 %v5109_v60  ;;  %v4269_v40 = vcombine.high %v6113_v37, %v6115_v38  ;;  %v5193_v60 = vld [vmem:[#allocation5 + $0x260] ss:$8 sps:$4 sm:$0xff]  }
 0x10b   :  { %2670 = vmatprep.subr.bf16.mxu1 %v5117_v61  ;;  %v5201_v61 = vld [vmem:[#allocation5 + $0x274] ss:$8 sps:$4 sm:$0xff]  }
 0x10d   :  { %2845 = vmatpush1.bf16.msra.mxu0 %v5033_v43  ;;  %v5120_v43 = vld [vmem:[#allocation5 + $0x684] ss:$8 sps:$4 sm:$0xff]  }
 0x10e   :  { %2846 = vmatprep.subr.bf16.mxu0 %v5041_v44  ;;  %2671 = vmatpush1.bf16.msra.mxu1 %v5115_v0  ;;  %v5169_v44 = vld [vmem:[#allocation5 + $0x220] ss:$8 sps:$4 sm:$0xff]   ;;  %v5199_v0 = vld [vmem:[#allocation5 + $0x270] ss:$8 sps:$4 sm:$0xff]  }
 0x10f   :  { %2672 = vmatprep.subr.bf16.mxu1 %v5123_v2  ;;  %v5148_v2 = vld [vmem:[#allocation5 + $0x6d0] ss:$8 sps:$4 sm:$0xff]  }
 0x111   :  { %2847 = vmatpush1.bf16.msra.mxu0 %v5039_v47  ;;  %v5126_v47 = vld [vmem:[#allocation5 + $0x694] ss:$8 sps:$4 sm:$0xff]  }
 0x112   :  { %2848 = vmatprep.subr.bf16.mxu0 %v5047_v48  ;;  %2673 = vmatpush1.bf16.msra.mxu1 %v5121_v4  ;;  %v5175_v48 = vld [vmem:[#allocation5 + $0x230] ss:$8 sps:$4 sm:$0xff]   ;;  %v5205_v4 = vld [vmem:[#allocation5 + $0x280] ss:$8 sps:$4 sm:$0xff]  }
 0x113   :  { %2674 = vmatprep.subr.bf16.mxu1 %v5129_v9  ;;  %v5213_v9 = vld [vmem:[#allocation5 + $0x294] ss:$8 sps:$4 sm:$0xff]  }
 0x115   :  { %2849 = vmatpush1.bf16.msra.mxu0 %v5045_v54  ;;  %v5130_v54 = vld [vmem:[#allocation5 + $0x6a0] ss:$8 sps:$4 sm:$0xff]  }
 0x116   :  { %2850 = vmatprep.subr.bf16.mxu0 %v5053_v55  ;;  %2675 = vmatpush1.bf16.msra.mxu1 %v5127_v14  ;;  %v5138_v55 = vld [vmem:[#allocation5 + $0x6b4] ss:$8 sps:$4 sm:$0xff]   ;;  %v5219_v14 = vld [vmem:[#allocation5 + $0x2a4] ss:$8 sps:$4 sm:$0xff]  }
 0x117   :  { %2676 = vmatprep.subr.bf16.mxu1 %v5135_v15  ;;  %v5168_v15 = vld [vmem:[#allocation5 + $0x704] ss:$8 sps:$4 sm:$0xff]  }
 0x119   :  { %2851 = vmatpush1.bf16.msra.mxu0 %v5051_v58  ;;  %v5136_v58 = vld [vmem:[#allocation5 + $0x6b0] ss:$8 sps:$4 sm:$0xff]  }
 0x11a   :  { %2852 = vmatprep.subr.bf16.mxu0 %v5059_v59  ;;  %2677 = vmatpush1.bf16.msra.mxu1 %v5133_v18  ;;  %v5144_v59 = vld [vmem:[#allocation5 + $0x6c4] ss:$8 sps:$4 sm:$0xff]   ;;  %v6121_v18 = vld [vmem:[#allocation2 + $0x98] sm:$0xff] }
 0x11b   :  { %2678 = vmatprep.subr.bf16.mxu1 %v5141_v6  ;;  %v5225_v6 = vld [vmem:[#allocation5 + $0x2b4] ss:$8 sps:$4 sm:$0xff]  }
 0x11d   :  { %2853 = vmatpush1.bf16.msra.mxu0 %v5057_v62  ;;  %v5142_v62 = vld [vmem:[#allocation5 + $0x6c0] ss:$8 sps:$4 sm:$0xff]  }
 0x11e   :  { %2854 = vmatprep.subr.bf16.mxu0 %v5066_v63  ;;  %2679 = vmatpush1.bf16.msra.mxu1 %v5139_v20  ;;  %v5150_v63 = vld [vmem:[#allocation5 + $0x6d4] ss:$8 sps:$4 sm:$0xff]  }
 0x11f   :  { %2680 = vmatprep.subr.bf16.mxu1 %v5147_v21  ;;  %v5174_v21 = vld [vmem:[#allocation5 + $0x714] ss:$8 sps:$4 sm:$0xff]  }
 0x121   :  { %2855 = vmatpush1.bf16.msra.mxu0 %v5064_v1  ;;  %v5207_v1 = vld [vmem:[#allocation5 + $0x284] ss:$8 sps:$4 sm:$0xff]  }
 0x122   :  { %2867 = vmatprep.subr.bf16.mxu0 %v5072_v3  ;;  %2681 = vmatpush1.bf16.msra.mxu1 %v5145_v24  ;;  %v5156_v3 = vld [vmem:[#allocation5 + $0x6e4] ss:$8 sps:$4 sm:$0xff]   ;;  %v5172_v24 = vld [vmem:[#allocation5 + $0x710] ss:$8 sps:$4 sm:$0xff]  }
 0x123   :  { %2682 = vmatprep.subr.bf16.mxu1 %v5153_v25  ;;  %v5180_v25 = vld [vmem:[#allocation5 + $0x724] ss:$8 sps:$4 sm:$0xff]  }
 0x124   :  { %2857 = vmatmul.mubr.bf16.vlgmr.msra.gmra.mrb[0].mxu0 %v4274_v10  ;;  %v5154_v10 = vld [vmem:[#allocation5 + $0x6e0] ss:$8 sps:$4 sm:$0xff]  }
 0x125   :  { %2868 = vmatpush1.bf16.msra.mxu0 %v5070_v11  ;;  %2899 = vmatprep.mubr.bf16.mxu0 %v4277_v12  ;;  %v5162_v11 = vld [vmem:[#allocation5 + $0x6f4] ss:$8 sps:$4 sm:$0xff]   ;;  %v5211_v12 = vld [vmem:[#allocation5 + $0x290] ss:$8 sps:$4 sm:$0xff]  }
 0x126   :  { %2869 = vmatprep.subr.bf16.mxu0 %v5078_v13  ;;  %2683 = vmatpush1.bf16.msra.mxu1 %v5151_v28  ;;  %v5160_v13 = vld [vmem:[#allocation5 + $0x6f0] ss:$8 sps:$4 sm:$0xff]  }
 0x127   :  { %2695 = vmatprep.subr.bf16.mxu1 %v5159_v29  ;;  %v5235_v28 = vld [vmem:[#allocation5 + $0x2d0] ss:$8 sps:$4 sm:$0xff]  }
 0x128   :  { %v5184_v29 = vld [vmem:[#allocation5 + $0x730] ss:$8 sps:$4 sm:$0xff]  }
 0x129   :  { %2870 = vmatpush1.bf16.msra.mxu0 %v5076_v16  ;;  %2685 = vmatmul.mubr.bf16.vlgmr.msra.gmra.mrb[0].mxu1 %v4266_v31  ;;  %v5217_v16 = vld [vmem:[#allocation5 + $0x2a0] ss:$8 sps:$4 sm:$0xff]   ;;  %v5192_v31 = vld [vmem:[#allocation5 + $0x744] ss:$8 sps:$4 sm:$0xff]  }
 0x12a   :  { %2871 = vmatprep.subr.bf16.mxu0 %v5084_v17  ;;  %2696 = vmatpush1.bf16.msra.mxu1 %v5157_v33  ;;  %v6119_v17 = vld [vmem:[#allocation2 + $0x38] sm:$0xff] }
 0x12b   :  { %2697 = vmatprep.subr.bf16.mxu1 %v5165_v34  ;;  %2727 = vmatprep.mubr.bf16.mxu1 %v4269_v40  ;;  %v4279_v20 = vcombine.high %v6119_v17, %v6121_v18  ;;  %v5249_v33 = vld [vmem:[#allocation5 + $0x2f4] ss:$8 sps:$4 sm:$0xff]   ;;  %v5190_v34 = vld [vmem:[#allocation5 + $0x740] ss:$8 sps:$4 sm:$0xff]  }
 0x12c   :  { %v6127_v40 = vld [vmem:[#allocation2 + $0x18] sm:$0xff] }
 0x12d   :  { %2872 = vmatpush1.bf16.msra.mxu0 %v5082_v7  ;;  %v4276_v7 = vcombine.low %v6103_v5, %v6105_v8  ;;  %v5237_v5 = vld [vmem:[#allocation5 + $0x2d4] ss:$8 sps:$4 sm:$0xff]   ;;  %v5178_v8 = vld [vmem:[#allocation5 + $0x720] ss:$8 sps:$4 sm:$0xff]  }
 0x12e   :  { %2873 = vmatprep.subr.bf16.mxu0 %v5090_v19  ;;  %2698 = vmatpush1.bf16.msra.mxu1 %v5163_v39  ;;  %v5166_v19 = vld [vmem:[#allocation5 + $0x700] ss:$8 sps:$4 sm:$0xff]   ;;  %v5255_v39 = vld [vmem:[#allocation5 + $0x304] ss:$8 sps:$4 sm:$0xff]  }
 0x12f   :  { %2699 = vmatprep.subr.bf16.mxu1 %v5171_v41  ;;  %v6129_v41 = vld [vmem:[#allocation2 + $0x78] sm:$0xff] }
 0x131   :  { %2874 = vmatpush1.bf16.msra.mxu0 %v5088_v22  ;;  %v5223_v22 = vld [vmem:[#allocation5 + $0x2b0] ss:$8 sps:$4 sm:$0xff]  }
 0x132   :  { %2875 = vmatprep.subr.bf16.mxu0 %v5096_v23  ;;  %2700 = vmatpush1.bf16.msra.mxu1 %v5169_v44  ;;  %v5231_v23 = vld [vmem:[#allocation5 + $0x2c4] ss:$8 sps:$4 sm:$0xff]   ;;  %v4268_v44 = vcombine.low %v6113_v37, %v6115_v38  ;;  %v5265_v38 = vld [vmem:[#allocation5 + $0x320] ss:$8 sps:$4 sm:$0xff]  }
 0x133   :  { %2701 = vmatprep.subr.bf16.mxu1 %v5177_v45  ;;  %v5253_v45 = vld [vmem:[#allocation5 + $0x300] ss:$8 sps:$4 sm:$0xff]   ;;  %v5216_v37 = vld [vmem:[#allocation5 + $0x784] ss:$8 sps:$4 sm:$0xff]  }
 0x135   :  { %2876 = vmatpush1.bf16.msra.mxu0 %v5094_v26  ;;  %v5229_v26 = vld [vmem:[#allocation5 + $0x2c0] ss:$8 sps:$4 sm:$0xff]  }
 0x136   :  { %2877 = vmatprep.subr.bf16.mxu0 %v5102_v27  ;;  %2702 = vmatpush1.bf16.msra.mxu1 %v5175_v48  ;;  %v5186_v27 = vld [vmem:[#allocation5 + $0x734] ss:$8 sps:$4 sm:$0xff]   ;;  %v4271_v48 = vcombine.high %v6127_v40, %v6129_v41 }
 0x137   :  { %2703 = vmatprep.subr.bf16.mxu1 %v5183_v49  ;;  %v5210_v49 = vld [vmem:[#allocation5 + $0x774] ss:$8 sps:$4 sm:$0xff]  }
 0x139   :  { %2878 = vmatpush1.bf16.msra.mxu0 %v5100_v30  ;;  %v5243_v30 = vld [vmem:[#allocation5 + $0x2e4] ss:$8 sps:$4 sm:$0xff]  }
 0x13a   :  { %2879 = vmatprep.subr.bf16.mxu0 %v5108_v32  ;;  %2704 = vmatpush1.bf16.msra.mxu1 %v5181_v52  ;;  %v5241_v32 = vld [vmem:[#allocation5 + $0x2e0] ss:$8 sps:$4 sm:$0xff]   ;;  %v5208_v52 = vld [vmem:[#allocation5 + $0x770] ss:$8 sps:$4 sm:$0xff]  }
 0x13b   :  { %2705 = vmatprep.subr.bf16.mxu1 %v5189_v53  ;;  %v5273_v53 = vld [vmem:[#allocation5 + $0x334] ss:$8 sps:$4 sm:$0xff]  }
 0x13d   :  { %2880 = vmatpush1.bf16.msra.mxu0 %v5106_v35  ;;  %v5198_v35 = vld [vmem:[#allocation5 + $0x754] ss:$8 sps:$4 sm:$0xff]  }
 0x13e   :  { %2881 = vmatprep.subr.bf16.mxu0 %v5114_v36  ;;  %2706 = vmatpush1.bf16.msra.mxu1 %v5187_v56  ;;  %v5247_v36 = vld [vmem:[#allocation5 + $0x2f0] ss:$8 sps:$4 sm:$0xff]  }
 0x13f   :  { %2707 = vmatprep.subr.bf16.mxu1 %v5195_v57  ;;  %v5271_v56 = vld [vmem:[#allocation5 + $0x330] ss:$8 sps:$4 sm:$0xff]   ;;  %v5279_v57 = vld [vmem:[#allocation5 + $0x344] ss:$8 sps:$4 sm:$0xff]  }
 0x141   :  { %2882 = vmatpush1.bf16.msra.mxu0 %v5112_v42  ;;  %v5196_v42 = vld [vmem:[#allocation5 + $0x750] ss:$8 sps:$4 sm:$0xff]  }
 0x142   :  { %2883 = vmatprep.subr.bf16.mxu0 %v5120_v43  ;;  %2708 = vmatpush1.bf16.msra.mxu1 %v5193_v60  ;;  %v5204_v43 = vld [vmem:[#allocation5 + $0x764] ss:$8 sps:$4 sm:$0xff]   ;;  %v5277_v60 = vld [vmem:[#allocation5 + $0x340] ss:$8 sps:$4 sm:$0xff]  }
 0x143   :  { %2709 = vmatprep.subr.bf16.mxu1 %v5201_v61  ;;  %v5285_v61 = vld [vmem:[#allocation5 + $0x354] ss:$8 sps:$4 sm:$0xff]  }
 0x145   :  { %2884 = vmatpush1.bf16.msra.mxu0 %v5118_v46  ;;  %v5261_v46 = vld [vmem:[#allocation5 + $0x314] ss:$8 sps:$4 sm:$0xff]  }
 0x146   :  { %2885 = vmatprep.subr.bf16.mxu0 %v5126_v47  ;;  %2710 = vmatpush1.bf16.msra.mxu1 %v5199_v0  ;;  %v5202_v47 = vld [vmem:[#allocation5 + $0x760] ss:$8 sps:$4 sm:$0xff]   ;;  %v5283_v0 = vld [vmem:[#allocation5 + $0x350] ss:$8 sps:$4 sm:$0xff]  }
 0x147   :  { %2711 = vmatprep.subr.bf16.mxu1 %v5207_v1  ;;  %v5291_v1 = vld [vmem:[#allocation5 + $0x364] ss:$8 sps:$4 sm:$0xff]  }
 0x149   :  { %2886 = vmatpush1.bf16.msra.mxu0 %v5124_v50  ;;  %v5259_v50 = vld [vmem:[#allocation5 + $0x310] ss:$8 sps:$4 sm:$0xff]  }
 0x14a   :  { %2887 = vmatprep.subr.bf16.mxu0 %v5132_v51  ;;  %2712 = vmatpush1.bf16.msra.mxu1 %v5205_v4  ;;  %v5267_v51 = vld [vmem:[#allocation5 + $0x324] ss:$8 sps:$4 sm:$0xff]   ;;  %v5289_v4 = vld [vmem:[#allocation5 + $0x360] ss:$8 sps:$4 sm:$0xff]  }
 0x14b   :  { %2713 = vmatprep.subr.bf16.mxu1 %v5213_v9  ;;  %v5297_v9 = vld [vmem:[#allocation5 + $0x374] ss:$8 sps:$4 sm:$0xff]  }
 0x14d   :  { %2888 = vmatpush1.bf16.msra.mxu0 %v5130_v54  ;;  %v5214_v54 = vld [vmem:[#allocation5 + $0x780] ss:$8 sps:$4 sm:$0xff]  }
 0x14e   :  { %2889 = vmatprep.subr.bf16.mxu0 %v5138_v55  ;;  %2714 = vmatpush1.bf16.msra.mxu1 %v5211_v12  ;;  %v5222_v55 = vld [vmem:[#allocation5 + $0x794] ss:$8 sps:$4 sm:$0xff]   ;;  %v5295_v12 = vld [vmem:[#allocation5 + $0x370] ss:$8 sps:$4 sm:$0xff]  }
 0x14f   :  { %2715 = vmatprep.subr.bf16.mxu1 %v5219_v14  ;;  %v5244_v14 = vld [vmem:[#allocation5 + $0x7d0] ss:$8 sps:$4 sm:$0xff]  }
 0x151   :  { %2890 = vmatpush1.bf16.msra.mxu0 %v5136_v58  ;;  %v5220_v58 = vld [vmem:[#allocation5 + $0x790] ss:$8 sps:$4 sm:$0xff]  }
 0x152   :  { %2891 = vmatprep.subr.bf16.mxu0 %v5144_v59  ;;  %2716 = vmatpush1.bf16.msra.mxu1 %v5217_v16  ;;  %v5228_v59 = vld [vmem:[#allocation5 + $0x7a4] ss:$8 sps:$4 sm:$0xff]   ;;  %v5301_v16 = vld [vmem:[#allocation5 + $0x380] ss:$8 sps:$4 sm:$0xff]  }
 0x153   :  { %2717 = vmatprep.subr.bf16.mxu1 %v5225_v6  ;;  %v5309_v6 = vld [vmem:[#allocation5 + $0x394] ss:$8 sps:$4 sm:$0xff]  }
 0x155   :  { %2892 = vmatpush1.bf16.msra.mxu0 %v5142_v62  ;;  %v5226_v62 = vld [vmem:[#allocation5 + $0x7a0] ss:$8 sps:$4 sm:$0xff]  }
 0x156   :  { %2893 = vmatprep.subr.bf16.mxu0 %v5150_v63  ;;  %2718 = vmatpush1.bf16.msra.mxu1 %v5223_v22  ;;  %v5234_v63 = vld [vmem:[#allocation5 + $0x7b4] ss:$8 sps:$4 sm:$0xff]   ;;  %v5256_v22 = vld [vmem:[#allocation5 + $0x7f0] ss:$8 sps:$4 sm:$0xff]  }
 0x157   :  { %2719 = vmatprep.subr.bf16.mxu1 %v5231_v23  ;;  %v5264_v23 = vld [vmem:[#allocation5 + $0x804] ss:$8 sps:$4 sm:$0xff]  }
 0x159   :  { %2894 = vmatpush1.bf16.msra.mxu0 %v5148_v2  ;;  %v5232_v2 = vld [vmem:[#allocation5 + $0x7b0] ss:$8 sps:$4 sm:$0xff]  }
 0x15a   :  { %2895 = vmatprep.subr.bf16.mxu0 %v5156_v3  ;;  %2720 = vmatpush1.bf16.msra.mxu1 %v5229_v26  ;;  %v5240_v3 = vld [vmem:[#allocation5 + $0x7c4] ss:$8 sps:$4 sm:$0xff]  }
 0x15b   :  { %2721 = vmatprep.subr.bf16.mxu1 %v5237_v5  ;;  %v6135_v26 = vld [vmem:[#allocation2 + $0x40] sm:$0xff] }
 0x15c   :  { %v6137_v5 = vld [vmem:[#allocation2 + $0xa0] sm:$0xff] }
 0x15d   :  { %2896 = vmatpush1.bf16.msra.mxu0 %v5154_v10  ;;  %v5238_v10 = vld [vmem:[#allocation5 + $0x7c0] ss:$8 sps:$4 sm:$0xff]  }
 0x15e   :  { %2897 = vmatprep.subr.bf16.mxu0 %v5162_v11  ;;  %2722 = vmatpush1.bf16.msra.mxu1 %v5235_v28  ;;  %v5246_v11 = vld [vmem:[#allocation5 + $0x7d4] ss:$8 sps:$4 sm:$0xff]  }
 0x15f   :  { %2723 = vmatprep.subr.bf16.mxu1 %v5243_v30  ;;  %v5270_v28 = vld [vmem:[#allocation5 + $0x814] ss:$8 sps:$4 sm:$0xff]   ;;  %v4281_v30 = vcombine.high %v6135_v26, %v6137_v5 }
 0x161   :  { %2898 = vmatpush1.bf16.msra.mxu0 %v5160_v13  ;;  %v5303_v13 = vld [vmem:[#allocation5 + $0x384] ss:$8 sps:$4 sm:$0xff]  }
 0x162   :  { %2910 = vmatprep.subr.bf16.mxu0 %v5168_v15  ;;  %2724 = vmatpush1.bf16.msra.mxu1 %v5241_v32  ;;  %v5252_v15 = vld [vmem:[#allocation5 + $0x7e4] ss:$8 sps:$4 sm:$0xff]   ;;  %v5268_v32 = vld [vmem:[#allocation5 + $0x810] ss:$8 sps:$4 sm:$0xff]  }
 0x163   :  { %2725 = vmatprep.subr.bf16.mxu1 %v5249_v33  ;;  %v5276_v33 = vld [vmem:[#allocation5 + $0x824] ss:$8 sps:$4 sm:$0xff]  }
 0x164   :  { %2900 = vmatmul.mubr.bf16.vlgmr.msra.gmra.mrb[0].mxu0 %v4276_v7  ;;  %v5250_v7 = vld [vmem:[#allocation5 + $0x7e0] ss:$8 sps:$4 sm:$0xff]  }
 0x165   :  { %2911 = vmatpush1.bf16.msra.mxu0 %v5166_v19  ;;  %2942 = vmatprep.mubr.bf16.mxu0 %v4279_v20  ;;  %v5258_v19 = vld [vmem:[#allocation5 + $0x7f4] ss:$8 sps:$4 sm:$0xff]   ;;  %v5307_v20 = vld [vmem:[#allocation5 + $0x390] ss:$8 sps:$4 sm:$0xff]  }
 0x166   :  { %2912 = vmatprep.subr.bf16.mxu0 %v5174_v21  ;;  %2726 = vmatpush1.bf16.msra.mxu1 %v5247_v36  ;;  %v5315_v21 = vld [vmem:[#allocation5 + $0x3a4] ss:$8 sps:$4 sm:$0xff]   ;;  %v5331_v36 = vld [vmem:[#allocation5 + $0x3d0] ss:$8 sps:$4 sm:$0xff]  }
 0x167   :  { %2738 = vmatprep.subr.bf16.mxu1 %v5255_v39  ;;  %v5339_v39 = vld [vmem:[#allocation5 + $0x3e4] ss:$8 sps:$4 sm:$0xff]  }
 0x169   :  { %2913 = vmatpush1.bf16.msra.mxu0 %v5172_v24  ;;  %2728 = vmatmul.mubr.bf16.vlgmr.msra.gmra.mrb[0].mxu1 %v4268_v44  ;;  %v5313_v24 = vld [vmem:[#allocation5 + $0x3a0] ss:$8 sps:$4 sm:$0xff]  }
 0x16a   :  { %2914 = vmatprep.subr.bf16.mxu0 %v5180_v25  ;;  %2739 = vmatpush1.bf16.msra.mxu1 %v5253_v45  ;;  %v5321_v25 = vld [vmem:[#allocation5 + $0x3b4] ss:$8 sps:$4 sm:$0xff]   ;;  %v5337_v44 = vld [vmem:[#allocation5 + $0x3e0] ss:$8 sps:$4 sm:$0xff]  }
 0x16b   :  { %2740 = vmatprep.subr.bf16.mxu1 %v5261_v46  ;;  %2770 = vmatprep.mubr.bf16.mxu1 %v4271_v48  ;;  %v5345_v45 = vld [vmem:[#allocation5 + $0x3f4] ss:$8 sps:$4 sm:$0xff]   ;;  %v5286_v46 = vld [vmem:[#allocation5 + $0x840] ss:$8 sps:$4 sm:$0xff]   ;;  %v5343_v48 = vld [vmem:[#allocation5 + $0x3f0] ss:$8 sps:$4 sm:$0xff]  }
 0x16d   :  { %2915 = vmatpush1.bf16.msra.mxu0 %v5178_v8  ;;  %v4278_v8 = vcombine.low %v6119_v17, %v6121_v18  ;;  %v5274_v17 = vld [vmem:[#allocation5 + $0x820] ss:$8 sps:$4 sm:$0xff]   ;;  %v5282_v18 = vld [vmem:[#allocation5 + $0x834] ss:$8 sps:$4 sm:$0xff]  }
 0x16e   :  { %2916 = vmatprep.subr.bf16.mxu0 %v5186_v27  ;;  %2741 = vmatpush1.bf16.msra.mxu1 %v5259_v50  ;;  %v5262_v27 = vld [vmem:[#allocation5 + $0x800] ss:$8 sps:$4 sm:$0xff]   ;;  %v5300_v50 = vld [vmem:[#allocation5 + $0x864] ss:$8 sps:$4 sm:$0xff]  }
 0x16f   :  { %2742 = vmatprep.subr.bf16.mxu1 %v5267_v51  ;;  %v4270_v51 = vcombine.low %v6127_v40, %v6129_v41  ;;  %v5322_v40 = vld [vmem:[#allocation5 + $0x8a0] ss:$8 sps:$4 sm:$0xff]   ;;  %v5330_v41 = vld [vmem:[#allocation5 + $0x8b4] ss:$8 sps:$4 sm:$0xff]  }
 0x171   :  { %2917 = vmatpush1.bf16.msra.mxu0 %v5184_v29  ;;  %v5319_v29 = vld [vmem:[#allocation5 + $0x3b0] ss:$8 sps:$4 sm:$0xff]  }
 0x172   :  { %2918 = vmatprep.subr.bf16.mxu0 %v5192_v31  ;;  %2743 = vmatpush1.bf16.msra.mxu1 %v5265_v38  ;;  %v5327_v31 = vld [vmem:[#allocation5 + $0x3c4] ss:$8 sps:$4 sm:$0xff]   ;;  %v5304_v38 = vld [vmem:[#allocation5 + $0x870] ss:$8 sps:$4 sm:$0xff]  }
 0x173   :  { %2744 = vmatprep.subr.bf16.mxu1 %v5273_v53  ;;  %v5312_v53 = vld [vmem:[#allocation5 + $0x884] ss:$8 sps:$4 sm:$0xff]  }
 0x175   :  { %2919 = vmatpush1.bf16.msra.mxu0 %v5190_v34  ;;  %v5325_v34 = vld [vmem:[#allocation5 + $0x3c0] ss:$8 sps:$4 sm:$0xff]  }
 0x176   :  { %2920 = vmatprep.subr.bf16.mxu0 %v5198_v35  ;;  %2745 = vmatpush1.bf16.msra.mxu1 %v5271_v56  ;;  %v5333_v35 = vld [vmem:[#allocation5 + $0x3d4] ss:$8 sps:$4 sm:$0xff]   ;;  %v5316_v56 = vld [vmem:[#allocation5 + $0x890] ss:$8 sps:$4 sm:$0xff]  }
 0x177   :  { %2746 = vmatprep.subr.bf16.mxu1 %v5279_v57  ;;  %v5324_v57 = vld [vmem:[#allocation5 + $0x8a4] ss:$8 sps:$4 sm:$0xff]  }
 0x179   :  { %2921 = vmatpush1.bf16.msra.mxu0 %v5196_v42  ;;  %v5280_v42 = vld [vmem:[#allocation5 + $0x830] ss:$8 sps:$4 sm:$0xff]  }
 0x17a   :  { %2922 = vmatprep.subr.bf16.mxu0 %v5204_v43  ;;  %2747 = vmatpush1.bf16.msra.mxu1 %v5277_v60  ;;  %v5288_v43 = vld [vmem:[#allocation5 + $0x844] ss:$8 sps:$4 sm:$0xff]   ;;  %v5334_v60 = vld [vmem:[#allocation5 + $0x8c0] ss:$8 sps:$4 sm:$0xff]  }
 0x17b   :  { %2748 = vmatprep.subr.bf16.mxu1 %v5285_v61  ;;  %v5342_v61 = vld [vmem:[#allocation5 + $0x8d4] ss:$8 sps:$4 sm:$0xff]  }
 0x17d   :  { %2923 = vmatpush1.bf16.msra.mxu0 %v5202_v47  ;;  %v5294_v47 = vld [vmem:[#allocation5 + $0x854] ss:$8 sps:$4 sm:$0xff]  }
 0x17e   :  { %2924 = vmatprep.subr.bf16.mxu0 %v5210_v49  ;;  %2749 = vmatpush1.bf16.msra.mxu1 %v5283_v0  ;;  %v5292_v49 = vld [vmem:[#allocation5 + $0x850] ss:$8 sps:$4 sm:$0xff]   ;;  %v5346_v0 = vld [vmem:[#allocation5 + $0x8e0] ss:$8 sps:$4 sm:$0xff]  }
 0x17f   :  { %2750 = vmatprep.subr.bf16.mxu1 %v5291_v1  ;;  %v5351_v1 = vld [vmem:[#allocation5 + $0x8f4] ss:$8 sps:$4 sm:$0xff]  }
 0x181   :  { %2925 = vmatpush1.bf16.msra.mxu0 %v5208_v52  ;;  %v5298_v52 = vld [vmem:[#allocation5 + $0x860] ss:$8 sps:$4 sm:$0xff]  }
 0x182   :  { %2926 = vmatprep.subr.bf16.mxu0 %v5216_v37  ;;  %2751 = vmatpush1.bf16.msra.mxu1 %v5289_v4  ;;  %v5306_v37 = vld [vmem:[#allocation5 + $0x874] ss:$8 sps:$4 sm:$0xff]   ;;  %v6145_v4 = vld [vmem:[#allocation2 + $0x48] sm:$0xff] }
 0x183   :  { %2752 = vmatprep.subr.bf16.mxu1 %v5297_v9  ;;  %v6147_v9 = vld [vmem:[#allocation2 + $0xa8] sm:$0xff] }
 0x185   :  { %2927 = vmatpush1.bf16.msra.mxu0 %v5214_v54  ;;  %v5310_v54 = vld [vmem:[#allocation5 + $0x880] ss:$8 sps:$4 sm:$0xff]  }
 0x186   :  { %2928 = vmatprep.subr.bf16.mxu0 %v5222_v55  ;;  %2753 = vmatpush1.bf16.msra.mxu1 %v5295_v12  ;;  %v5318_v55 = vld [vmem:[#allocation5 + $0x894] ss:$8 sps:$4 sm:$0xff]   ;;  %v4283_v12 = vcombine.high %v6145_v4, %v6147_v9 }
 0x187   :  { %2754 = vmatprep.subr.bf16.mxu1 %v5303_v13  ;;  %v5357_v13 = vld [vmem:[#allocation5 + $0x914] ss:$8 sps:$4 sm:$0xff]  }
 0x189   :  { %2929 = vmatpush1.bf16.msra.mxu0 %v5220_v58  ;;  %v5328_v58 = vld [vmem:[#allocation5 + $0x8b0] ss:$8 sps:$4 sm:$0xff]  }
 0x18a   :  { %2930 = vmatprep.subr.bf16.mxu0 %v5228_v59  ;;  %2755 = vmatpush1.bf16.msra.mxu1 %v5301_v16  ;;  %v5336_v59 = vld [vmem:[#allocation5 + $0x8c4] ss:$8 sps:$4 sm:$0xff]   ;;  %v5358_v16 = vld [vmem:[#allocation5 + $0x920] ss:$8 sps:$4 sm:$0xff]  }
 0x18b   :  { %2756 = vmatprep.subr.bf16.mxu1 %v5309_v6  ;;  %v5363_v6 = vld [vmem:[#allocation5 + $0x934] ss:$8 sps:$4 sm:$0xff]  }
 0x18d   :  { %2931 = vmatpush1.bf16.msra.mxu0 %v5226_v62  ;;  %v5340_v62 = vld [vmem:[#allocation5 + $0x8d0] ss:$8 sps:$4 sm:$0xff]  }
 0x18e   :  { %2932 = vmatprep.subr.bf16.mxu0 %v5234_v63  ;;  %2757 = vmatpush1.bf16.msra.mxu1 %v5307_v20  ;;  %v5348_v63 = vld [vmem:[#allocation5 + $0x8e4] ss:$8 sps:$4 sm:$0xff]   ;;  %v5364_v20 = vld [vmem:[#allocation5 + $0x940] ss:$8 sps:$4 sm:$0xff]  }
 0x18f   :  { %2758 = vmatprep.subr.bf16.mxu1 %v5315_v21  ;;  %v5369_v21 = vld [vmem:[#allocation5 + $0x954] ss:$8 sps:$4 sm:$0xff]  }
 0x191   :  { %2933 = vmatpush1.bf16.msra.mxu0 %v5232_v2  ;;  %v5349_v2 = vld [vmem:[#allocation5 + $0x8f0] ss:$8 sps:$4 sm:$0xff]  }
 0x192   :  { %2934 = vmatprep.subr.bf16.mxu0 %v5240_v3  ;;  %2759 = vmatpush1.bf16.msra.mxu1 %v5313_v24  ;;  %v5354_v3 = vld [vmem:[#allocation5 + $0x904] ss:$8 sps:$4 sm:$0xff]   ;;  %v5370_v24 = vld [vmem:[#allocation5 + $0x960] ss:$8 sps:$4 sm:$0xff]  }
 0x193   :  { %2760 = vmatprep.subr.bf16.mxu1 %v5321_v25  ;;  %v5375_v25 = vld [vmem:[#allocation5 + $0x974] ss:$8 sps:$4 sm:$0xff]  }
 0x195   :  { %2935 = vmatpush1.bf16.msra.mxu0 %v5238_v10  ;;  %v4280_v10 = vcombine.low %v6135_v26, %v6137_v5  ;;  %v5373_v26 = vld [vmem:[#allocation5 + $0x970] ss:$8 sps:$4 sm:$0xff]   ;;  %v5378_v5 = vld [vmem:[#allocation5 + $0x984] ss:$8 sps:$4 sm:$0xff]  }
 0x196   :  { %2936 = vmatprep.subr.bf16.mxu0 %v5246_v11  ;;  %2761 = vmatpush1.bf16.msra.mxu1 %v5319_v29  ;;  %v5352_v11 = vld [vmem:[#allocation5 + $0x900] ss:$8 sps:$4 sm:$0xff]   ;;  %v5384_v29 = vld [vmem:[#allocation5 + $0x9a4] ss:$8 sps:$4 sm:$0xff]  }
 0x197   :  { %2762 = vmatprep.subr.bf16.mxu1 %v5327_v31  ;;  %v5387_v31 = vld [vmem:[#allocation5 + $0x9b4] ss:$8 sps:$4 sm:$0xff]  }
 0x199   :  { %2937 = vmatpush1.bf16.msra.mxu0 %v5244_v14  ;;  %v5355_v14 = vld [vmem:[#allocation5 + $0x910] ss:$8 sps:$4 sm:$0xff]  }
 0x19a   :  { %2938 = vmatprep.subr.bf16.mxu0 %v5252_v15  ;;  %2763 = vmatpush1.bf16.msra.mxu1 %v5325_v34  ;;  %v5360_v15 = vld [vmem:[#allocation5 + $0x924] ss:$8 sps:$4 sm:$0xff]   ;;  %v5388_v34 = vld [vmem:[#allocation5 + $0x9c0] ss:$8 sps:$4 sm:$0xff]  }
 0x19b   :  { %2764 = vmatprep.subr.bf16.mxu1 %v5333_v35  ;;  %v5393_v35 = vld [vmem:[#allocation5 + $0x9d4] ss:$8 sps:$4 sm:$0xff]  }
 0x19d   :  { %2939 = vmatpush1.bf16.msra.mxu0 %v5250_v7  ;;  %v5361_v7 = vld [vmem:[#allocation5 + $0x930] ss:$8 sps:$4 sm:$0xff]  }
 0x19e   :  { %2940 = vmatprep.subr.bf16.mxu0 %v5258_v19  ;;  %2765 = vmatpush1.bf16.msra.mxu1 %v5331_v36  ;;  %v5366_v19 = vld [vmem:[#allocation5 + $0x944] ss:$8 sps:$4 sm:$0xff]   ;;  %v5394_v36 = vld [vmem:[#allocation5 + $0x9e0] ss:$8 sps:$4 sm:$0xff]  }
 0x19f   :  { %2766 = vmatprep.subr.bf16.mxu1 %v5339_v39  ;;  %v5399_v39 = vld [vmem:[#allocation5 + $0x9f4] ss:$8 sps:$4 sm:$0xff]  }
 0x1a1   :  { %2941 = vmatpush1.bf16.msra.mxu0 %v5256_v22  ;;  %v5367_v22 = vld [vmem:[#allocation5 + $0x950] ss:$8 sps:$4 sm:$0xff]  }
 0x1a2   :  { %2953 = vmatprep.subr.bf16.mxu0 %v5264_v23  ;;  %2767 = vmatpush1.bf16.msra.mxu1 %v5337_v44  ;;  %v5372_v23 = vld [vmem:[#allocation5 + $0x964] ss:$8 sps:$4 sm:$0xff]   ;;  %v6153_v44 = vld [vmem:[#allocation2 + $0x50] sm:$0xff] }
 0x1a3   :  { %2768 = vmatprep.subr.bf16.mxu1 %v5345_v45  ;;  %v6155_v45 = vld [vmem:[#allocation2 + $0xb0] sm:$0xff] }
 0x1a4   :  { %2943 = vmatmul.mubr.bf16.vlgmr.msra.gmra.mrb[0].mxu0 %v4278_v8  ;;  %v5376_v8 = vld [vmem:[#allocation5 + $0x980] ss:$8 sps:$4 sm:$0xff]  }
 0x1a5   :  { %2954 = vmatpush1.bf16.msra.mxu0 %v5262_v27  ;;  %2985 = vmatprep.mubr.bf16.mxu0 %v4281_v30  ;;  %v5381_v27 = vld [vmem:[#allocation5 + $0x994] ss:$8 sps:$4 sm:$0xff]   ;;  %v5382_v30 = vld [vmem:[#allocation5 + $0x9a0] ss:$8 sps:$4 sm:$0xff]  }
 0x1a6   :  { %2955 = vmatprep.subr.bf16.mxu0 %v5270_v28  ;;  %2769 = vmatpush1.bf16.msra.mxu1 %v5343_v48  ;;  %v5379_v28 = vld [vmem:[#allocation5 + $0x990] ss:$8 sps:$4 sm:$0xff]   ;;  %v4285_v48 = vcombine.high %v6153_v44, %v6155_v45 }
 0x1a9   :  { %2956 = vmatpush1.bf16.msra.mxu0 %v5268_v32  ;;  %2771 = vmatmul.mubr.bf16.vlgmr.msra.gmra.mrb[0].mxu1 %v4270_v51  ;;  %v5385_v32 = vld [vmem:[#allocation5 + $0x9b0] ss:$8 sps:$4 sm:$0xff]  }
 0x1aa   :  { %2957 = vmatprep.subr.bf16.mxu0 %v5276_v33  ;;  %v5390_v33 = vld [vmem:[#allocation5 + $0x9c4] ss:$8 sps:$4 sm:$0xff]  }
 0x1ab   :  { %v5498_v51 = vld [vmem:[#allocation8 + $0x4] ss:$8 sps:$4 sm:$0xff]  }
 0x1ac   :  { %3335 = vmatprep.subr.bf16.mxu1 %v5498_v51  ;;  %v5456_v51 = vld [vmem:[#allocation5 + $0xb24] ss:$8 sps:$4 sm:$0xff]  }
 0x1ad   :  { %2958 = vmatpush1.bf16.msra.mxu0 %v5274_v17  ;;  %v5391_v17 = vld [vmem:[#allocation5 + $0x9d0] ss:$8 sps:$4 sm:$0xff]  }
 0x1ae   :  { %2959 = vmatprep.subr.bf16.mxu0 %v5282_v18  ;;  %v5396_v18 = vld [vmem:[#allocation5 + $0x9e4] ss:$8 sps:$4 sm:$0xff]  }
 0x1b1   :  { %2960 = vmatpush1.bf16.msra.mxu0 %v5280_v42  ;;  %v5397_v42 = vld [vmem:[#allocation5 + $0x9f0] ss:$8 sps:$4 sm:$0xff]  }
 0x1b2   :  { %2961 = vmatprep.subr.bf16.mxu0 %v5288_v43  ;;  %v5402_v43 = vld [vmem:[#allocation5 + $0xa04] ss:$8 sps:$4 sm:$0xff]  }
 0x1b5   :  { %2962 = vmatpush1.bf16.msra.mxu0 %v5286_v46  ;;  %v4282_v46 = vcombine.low %v6145_v4, %v6147_v9  ;;  %v5516_v4 = vld [vmem:[#allocation8 + $0x64] ss:$8 sps:$4 sm:$0xff]  }
 0x1b6   :  { %2963 = vmatprep.subr.bf16.mxu0 %v5294_v47  ;;  %v5400_v47 = vld [vmem:[#allocation5 + $0xa00] ss:$8 sps:$4 sm:$0xff]  }
 0x1b7   :  { %v5418_v9 = vld [vmem:[#allocation5 + $0xa60] ss:$8 sps:$4 sm:$0xff]  }
 0x1b9   :  { %2964 = vmatpush1.bf16.msra.mxu0 %v5292_v49  ;;  %v5405_v49 = vld [vmem:[#allocation5 + $0xa14] ss:$8 sps:$4 sm:$0xff]  }
 0x1ba   :  { %2965 = vmatprep.subr.bf16.mxu0 %v5300_v50  ;;  %v5496_v50 = vld [vmem:[#allocation8] ss:$8 sps:$4 sm:$0xff]  }
 0x1bb   :  { %3336 = vmatpush1.bf16.msra.mxu1 %v5496_v50  ;;  %v5451_v50 = vld [vmem:[#allocation5 + $0xb10] ss:$8 sps:$4 sm:$0xff]  }
 0x1bd   :  { %2966 = vmatpush1.bf16.msra.mxu0 %v5298_v52  ;;  %v5403_v52 = vld [vmem:[#allocation5 + $0xa10] ss:$8 sps:$4 sm:$0xff]  }
 0x1be   :  { %2967 = vmatprep.subr.bf16.mxu0 %v5306_v37  ;;  %v5501_v37 = vld [vmem:[#allocation8 + $0x14] ss:$8 sps:$4 sm:$0xff]  }
 0x1bf   :  { %3337 = vmatprep.subr.bf16.mxu1 %v5501_v37  ;;  %v5459_v37 = vld [vmem:[#allocation5 + $0xb34] ss:$8 sps:$4 sm:$0xff]  }
 0x1c1   :  { %2968 = vmatpush1.bf16.msra.mxu0 %v5304_v38  ;;  %v5408_v38 = vld [vmem:[#allocation5 + $0xa24] ss:$8 sps:$4 sm:$0xff]  }
 0x1c2   :  { %2969 = vmatprep.subr.bf16.mxu0 %v5312_v53  ;;  %v5499_v53 = vld [vmem:[#allocation8 + $0x10] ss:$8 sps:$4 sm:$0xff]  }
 0x1c3   :  { %3338 = vmatpush1.bf16.msra.mxu1 %v5499_v53  ;;  %v5465_v53 = vld [vmem:[#allocation5 + $0xb54] ss:$8 sps:$4 sm:$0xff]  }
 0x1c5   :  { %2970 = vmatpush1.bf16.msra.mxu0 %v5310_v54  ;;  %v5504_v54 = vld [vmem:[#allocation8 + $0x24] ss:$8 sps:$4 sm:$0xff]  }
 0x1c6   :  { %2971 = vmatprep.subr.bf16.mxu0 %v5318_v55  ;;  %v5406_v55 = vld [vmem:[#allocation5 + $0xa20] ss:$8 sps:$4 sm:$0xff]   ;;  %3339 = vmatprep.subr.bf16.mxu1 %v5504_v54  ;;  %v5463_v54 = vld [vmem:[#allocation5 + $0xb50] ss:$8 sps:$4 sm:$0xff]  }
 0x1c9   :  { %2972 = vmatpush1.bf16.msra.mxu0 %v5316_v56  ;;  %v5411_v56 = vld [vmem:[#allocation5 + $0xa34] ss:$8 sps:$4 sm:$0xff]  }
 0x1ca   :  { %2973 = vmatprep.subr.bf16.mxu0 %v5324_v57  ;;  %v5502_v57 = vld [vmem:[#allocation8 + $0x20] ss:$8 sps:$4 sm:$0xff]  }
 0x1cb   :  { %3340 = vmatpush1.bf16.msra.mxu1 %v5502_v57  ;;  %v5471_v57 = vld [vmem:[#allocation5 + $0xb74] ss:$8 sps:$4 sm:$0xff]  }
 0x1cd   :  { %2974 = vmatpush1.bf16.msra.mxu0 %v5322_v40  ;;  %v5507_v40 = vld [vmem:[#allocation8 + $0x34] ss:$8 sps:$4 sm:$0xff]  }
 0x1ce   :  { %2975 = vmatprep.subr.bf16.mxu0 %v5330_v41  ;;  %v5409_v41 = vld [vmem:[#allocation5 + $0xa30] ss:$8 sps:$4 sm:$0xff]   ;;  %3341 = vmatprep.subr.bf16.mxu1 %v5507_v40 }
 0x1cf   :  { %v5469_v40 = vld [vmem:[#allocation5 + $0xb70] ss:$8 sps:$4 sm:$0xff]  }
 0x1d1   :  { %2976 = vmatpush1.bf16.msra.mxu0 %v5328_v58  ;;  %v5414_v58 = vld [vmem:[#allocation5 + $0xa44] ss:$8 sps:$4 sm:$0xff]  }
 0x1d2   :  { %2977 = vmatprep.subr.bf16.mxu0 %v5336_v59  ;;  %v5505_v59 = vld [vmem:[#allocation8 + $0x30] ss:$8 sps:$4 sm:$0xff]  }
 0x1d3   :  { %3342 = vmatpush1.bf16.msra.mxu1 %v5505_v59  ;;  %v5477_v59 = vld [vmem:[#allocation5 + $0xb94] ss:$8 sps:$4 sm:$0xff]  }
 0x1d5   :  { %2978 = vmatpush1.bf16.msra.mxu0 %v5334_v60  ;;  %v5510_v60 = vld [vmem:[#allocation8 + $0x44] ss:$8 sps:$4 sm:$0xff]  }
 0x1d6   :  { %2979 = vmatprep.subr.bf16.mxu0 %v5342_v61  ;;  %v5412_v61 = vld [vmem:[#allocation5 + $0xa40] ss:$8 sps:$4 sm:$0xff]   ;;  %3343 = vmatprep.subr.bf16.mxu1 %v5510_v60  ;;  %v5475_v60 = vld [vmem:[#allocation5 + $0xb90] ss:$8 sps:$4 sm:$0xff]  }
 0x1d9   :  { %2980 = vmatpush1.bf16.msra.mxu0 %v5340_v62  ;;  %v5417_v62 = vld [vmem:[#allocation5 + $0xa54] ss:$8 sps:$4 sm:$0xff]  }
 0x1da   :  { %2981 = vmatprep.subr.bf16.mxu0 %v5348_v63  ;;  %v5508_v63 = vld [vmem:[#allocation8 + $0x40] ss:$8 sps:$4 sm:$0xff]  }
 0x1db   :  { %3344 = vmatpush1.bf16.msra.mxu1 %v5508_v63  ;;  %v5483_v63 = vld [vmem:[#allocation5 + $0xbb4] ss:$8 sps:$4 sm:$0xff]  }
 0x1dd   :  { %2982 = vmatpush1.bf16.msra.mxu0 %v5346_v0  ;;  %v5513_v0 = vld [vmem:[#allocation8 + $0x54] ss:$8 sps:$4 sm:$0xff]  }
 0x1de   :  { %2983 = vmatprep.subr.bf16.mxu0 %v5351_v1  ;;  %v5415_v1 = vld [vmem:[#allocation5 + $0xa50] ss:$8 sps:$4 sm:$0xff]   ;;  %3345 = vmatprep.subr.bf16.mxu1 %v5513_v0 }
 0x1e1   :  { %2984 = vmatpush1.bf16.msra.mxu0 %v5349_v2  ;;  %v5420_v2 = vld [vmem:[#allocation5 + $0xa64] ss:$8 sps:$4 sm:$0xff]  }
 0x1e2   :  { %2996 = vmatprep.subr.bf16.mxu0 %v5354_v3  ;;  %v5511_v3 = vld [vmem:[#allocation8 + $0x50] ss:$8 sps:$4 sm:$0xff]  }
 0x1e3   :  { %3346 = vmatpush1.bf16.msra.mxu1 %v5511_v3  ;;  %v5486_v3 = vld [vmem:[#allocation5 + $0xbc4] ss:$8 sps:$4 sm:$0xff]  }
 0x1e4   :  { %2986 = vmatmul.mubr.bf16.vlgmr.msra.gmra.mrb[0].mxu0 %v4280_v10  ;;  %v5423_v10 = vld [vmem:[#allocation5 + $0xa74] ss:$8 sps:$4 sm:$0xff]   ;;  %3347 = vmatprep.subr.bf16.mxu1 %v5516_v4 }
 0x1e5   :  { %2997 = vmatpush1.bf16.msra.mxu0 %v5352_v11  ;;  %3028 = vmatprep.mubr.bf16.mxu0 %v4283_v12  ;;  %v5514_v11 = vld [vmem:[#allocation8 + $0x60] ss:$8 sps:$4 sm:$0xff]   ;;  %v5519_v12 = vld [vmem:[#allocation8 + $0x74] ss:$8 sps:$4 sm:$0xff]  }
 0x1e6   :  { %2998 = vmatprep.subr.bf16.mxu0 %v5357_v13  ;;  %v5421_v13 = vld [vmem:[#allocation5 + $0xa70] ss:$8 sps:$4 sm:$0xff]  }
 0x1e7   :  { %3348 = vmatpush1.bf16.msra.mxu1 %v5514_v11  ;;  %v5489_v11 = vld [vmem:[#allocation5 + $0xbd4] ss:$8 sps:$4 sm:$0xff]  }
 0x1e8   :  { %3349 = vmatprep.subr.bf16.mxu1 %v5519_v12  ;;  %v5487_v12 = vld [vmem:[#allocation5 + $0xbd0] ss:$8 sps:$4 sm:$0xff]  }
 0x1e9   :  { %2999 = vmatpush1.bf16.msra.mxu0 %v5355_v14  ;;  %v5426_v14 = vld [vmem:[#allocation5 + $0xa84] ss:$8 sps:$4 sm:$0xff]  }
 0x1ea   :  { %3000 = vmatprep.subr.bf16.mxu0 %v5360_v15  ;;  %v5517_v15 = vld [vmem:[#allocation8 + $0x70] ss:$8 sps:$4 sm:$0xff]  }
 0x1eb   :  { %3350 = vmatpush1.bf16.msra.mxu1 %v5517_v15  ;;  %v5495_v15 = vld [vmem:[#allocation5 + $0xbf4] ss:$8 sps:$4 sm:$0xff]  }
 0x1ed   :  { %3001 = vmatpush1.bf16.msra.mxu0 %v5358_v16  ;;  %v5522_v16 = vld [vmem:[#allocation8 + $0x84] ss:$8 sps:$4 sm:$0xff]  }
 0x1ee   :  { %3002 = vmatprep.subr.bf16.mxu0 %v5363_v6  ;;  %v5424_v6 = vld [vmem:[#allocation5 + $0xa80] ss:$8 sps:$4 sm:$0xff]   ;;  %3351 = vmatprep.subr.bf16.mxu1 %v5522_v16  ;;  %v5493_v16 = vld [vmem:[#allocation5 + $0xbf0] ss:$8 sps:$4 sm:$0xff]  }
 0x1f1   :  { %3003 = vmatpush1.bf16.msra.mxu0 %v5361_v7  ;;  %v5429_v7 = vld [vmem:[#allocation5 + $0xa94] ss:$8 sps:$4 sm:$0xff]  }
 0x1f2   :  { %3004 = vmatprep.subr.bf16.mxu0 %v5366_v19  ;;  %v5520_v19 = vld [vmem:[#allocation8 + $0x80] ss:$8 sps:$4 sm:$0xff]  }
 0x1f3   :  { %3352 = vmatpush1.bf16.msra.mxu1 %v5520_v19  ;;  %v5535_v19 = vld [vmem:[#allocation8 + $0xd0] ss:$8 sps:$4 sm:$0xff]  }
 0x1f5   :  { %3005 = vmatpush1.bf16.msra.mxu0 %v5364_v20  ;;  %v5525_v20 = vld [vmem:[#allocation8 + $0x94] ss:$8 sps:$4 sm:$0xff]  }
 0x1f6   :  { %3006 = vmatprep.subr.bf16.mxu0 %v5369_v21  ;;  %v5427_v21 = vld [vmem:[#allocation5 + $0xa90] ss:$8 sps:$4 sm:$0xff]   ;;  %3353 = vmatprep.subr.bf16.mxu1 %v5525_v20 }
 0x1f7   :  { %v5540_v20 = vld [vmem:[#allocation8 + $0xe4] ss:$8 sps:$4 sm:$0xff]  }
 0x1f9   :  { %3007 = vmatpush1.bf16.msra.mxu0 %v5367_v22  ;;  %v5432_v22 = vld [vmem:[#allocation5 + $0xaa4] ss:$8 sps:$4 sm:$0xff]  }
 0x1fa   :  { %3008 = vmatprep.subr.bf16.mxu0 %v5372_v23  ;;  %v5523_v23 = vld [vmem:[#allocation8 + $0x90] ss:$8 sps:$4 sm:$0xff]  }
 0x1fb   :  { %3354 = vmatpush1.bf16.msra.mxu1 %v5523_v23  ;;  %v5541_v23 = vld [vmem:[#allocation8 + $0xf0] ss:$8 sps:$4 sm:$0xff]  }
 0x1fd   :  { %3009 = vmatpush1.bf16.msra.mxu0 %v5370_v24  ;;  %v5528_v24 = vld [vmem:[#allocation8 + $0xa4] ss:$8 sps:$4 sm:$0xff]  }
 0x1fe   :  { %3010 = vmatprep.subr.bf16.mxu0 %v5375_v25  ;;  %v5430_v25 = vld [vmem:[#allocation5 + $0xaa0] ss:$8 sps:$4 sm:$0xff]   ;;  %3355 = vmatprep.subr.bf16.mxu1 %v5528_v24 }
 0x1ff   :  { %v5546_v24 = vld [vmem:[#allocation11 + $0x4] ss:$16 sps:$4 sm:$0xff]  }
 0x201   :  { %3011 = vmatpush1.bf16.msra.mxu0 %v5373_v26  ;;  %v5435_v26 = vld [vmem:[#allocation5 + $0xab4] ss:$8 sps:$4 sm:$0xff]  }
 0x202   :  { %3012 = vmatprep.subr.bf16.mxu0 %v5378_v5  ;;  %v5526_v5 = vld [vmem:[#allocation8 + $0xa0] ss:$8 sps:$4 sm:$0xff]  }
 0x203   :  { %3356 = vmatpush1.bf16.msra.mxu1 %v5526_v5 }
 0x205   :  { %3013 = vmatpush1.bf16.msra.mxu0 %v5376_v8  ;;  %v5531_v8 = vld [vmem:[#allocation8 + $0xb4] ss:$8 sps:$4 sm:$0xff]  }
 0x206   :  { %3014 = vmatprep.subr.bf16.mxu0 %v5381_v27  ;;  %v5433_v27 = vld [vmem:[#allocation5 + $0xab0] ss:$8 sps:$4 sm:$0xff]   ;;  %3357 = vmatprep.subr.bf16.mxu1 %v5531_v8  ;;  %v557_v8 = vld [vmem:[#allocation7] sm:$0x3] }
 0x209   :  { %3015 = vmatpush1.bf16.msra.mxu0 %v5379_v28  ;;  %v5438_v28 = vld [vmem:[#allocation5 + $0xac4] ss:$8 sps:$4 sm:$0xff]  }
 0x20a   :  { %3016 = vmatprep.subr.bf16.mxu0 %v5384_v29  ;;  %v5529_v29 = vld [vmem:[#allocation8 + $0xb0] ss:$8 sps:$4 sm:$0xff]  }
 0x20b   :  { %3358 = vmatpush1.bf16.msra.mxu1 %v5529_v29 }
 0x20d   :  { %3017 = vmatpush1.bf16.msra.mxu0 %v5382_v30  ;;  %v5534_v30 = vld [vmem:[#allocation8 + $0xc4] ss:$8 sps:$4 sm:$0xff]  }
 0x20e   :  { %3018 = vmatprep.subr.bf16.mxu0 %v5387_v31  ;;  %v5436_v31 = vld [vmem:[#allocation5 + $0xac0] ss:$8 sps:$4 sm:$0xff]   ;;  %3359 = vmatprep.subr.bf16.mxu1 %v5534_v30 }
 0x211   :  { %3019 = vmatpush1.bf16.msra.mxu0 %v5385_v32  ;;  %v5441_v32 = vld [vmem:[#allocation5 + $0xad4] ss:$8 sps:$4 sm:$0xff]  }
 0x212   :  { %3020 = vmatprep.subr.bf16.mxu0 %v5390_v33  ;;  %v5532_v33 = vld [vmem:[#allocation8 + $0xc0] ss:$8 sps:$4 sm:$0xff]  }
 0x213   :  { %3360 = vmatpush1.bf16.msra.mxu1 %v5532_v33 }
 0x215   :  { %3021 = vmatpush1.bf16.msra.mxu0 %v5388_v34  ;;  %v5439_v34 = vld [vmem:[#allocation5 + $0xad0] ss:$8 sps:$4 sm:$0xff]  }
 0x216   :  { %3022 = vmatprep.subr.bf16.mxu0 %v5393_v35  ;;  %v5444_v35 = vld [vmem:[#allocation5 + $0xae4] ss:$8 sps:$4 sm:$0xff]  }
 0x219   :  { %3023 = vmatpush1.bf16.msra.mxu0 %v5391_v17  ;;  %v5442_v17 = vld [vmem:[#allocation5 + $0xae0] ss:$8 sps:$4 sm:$0xff]  }
 0x21a   :  { %3024 = vmatprep.subr.bf16.mxu0 %v5396_v18  ;;  %v5447_v18 = vld [vmem:[#allocation5 + $0xaf4] ss:$8 sps:$4 sm:$0xff]  }
 0x21d   :  { %3025 = vmatpush1.bf16.msra.mxu0 %v5394_v36  ;;  %v5445_v36 = vld [vmem:[#allocation5 + $0xaf0] ss:$8 sps:$4 sm:$0xff]  }
 0x21e   :  { %3026 = vmatprep.subr.bf16.mxu0 %v5399_v39  ;;  %v5450_v39 = vld [vmem:[#allocation5 + $0xb04] ss:$8 sps:$4 sm:$0xff]  }
 0x221   :  { %3027 = vmatpush1.bf16.msra.mxu0 %v5397_v42  ;;  %v6161_v42 = vld [vmem:[#allocation2 + $0x58] sm:$0xff] }
 0x222   :  { %3039 = vmatprep.subr.bf16.mxu0 %v5402_v43  ;;  %v6163_v43 = vld [vmem:[#allocation2 + $0xb8] sm:$0xff] }
 0x224   :  { %3029 = vmatmul.mubr.bf16.vlgmr.msra.gmra.mrb[0].mxu0 %v4282_v46  ;;  %v4284_v46 = vcombine.low %v6153_v44, %v6155_v45  ;;  %v5462_v44 = vld [vmem:[#allocation5 + $0xb44] ss:$8 sps:$4 sm:$0xff]   ;;  %v5460_v45 = vld [vmem:[#allocation5 + $0xb40] ss:$8 sps:$4 sm:$0xff]  }
 0x225   :  { %3040 = vmatpush1.bf16.msra.mxu0 %v5400_v47  ;;  %3071 = vmatprep.mubr.bf16.mxu0 %v4285_v48  ;;  %v5448_v47 = vld [vmem:[#allocation5 + $0xb00] ss:$8 sps:$4 sm:$0xff]   ;;  %v4287_v48 = vcombine.high %v6161_v42, %v6163_v43 }
 0x226   :  { %3041 = vmatprep.subr.bf16.mxu0 %v5405_v49  ;;  %v5453_v49 = vld [vmem:[#allocation5 + $0xb14] ss:$8 sps:$4 sm:$0xff]  }
 0x229   :  { %3042 = vmatpush1.bf16.msra.mxu0 %v5403_v52  ;;  %v5454_v52 = vld [vmem:[#allocation5 + $0xb20] ss:$8 sps:$4 sm:$0xff]  }
 0x22a   :  { %3043 = vmatprep.subr.bf16.mxu0 %v5408_v38  ;;  %v5457_v38 = vld [vmem:[#allocation5 + $0xb30] ss:$8 sps:$4 sm:$0xff]  }
 0x22d   :  { %3044 = vmatpush1.bf16.msra.mxu0 %v5406_v55  ;;  %v5468_v55 = vld [vmem:[#allocation5 + $0xb64] ss:$8 sps:$4 sm:$0xff]  }
 0x22e   :  { %3045 = vmatprep.subr.bf16.mxu0 %v5411_v56  ;;  %v5466_v56 = vld [vmem:[#allocation5 + $0xb60] ss:$8 sps:$4 sm:$0xff]  }
 0x231   :  { %3046 = vmatpush1.bf16.msra.mxu0 %v5409_v41  ;;  %v5474_v41 = vld [vmem:[#allocation5 + $0xb84] ss:$8 sps:$4 sm:$0xff]  }
 0x232   :  { %3047 = vmatprep.subr.bf16.mxu0 %v5414_v58  ;;  %v5472_v58 = vld [vmem:[#allocation5 + $0xb80] ss:$8 sps:$4 sm:$0xff]  }
 0x235   :  { %3048 = vmatpush1.bf16.msra.mxu0 %v5412_v61  ;;  %v5480_v61 = vld [vmem:[#allocation5 + $0xba4] ss:$8 sps:$4 sm:$0xff]  }
 0x236   :  { %3049 = vmatprep.subr.bf16.mxu0 %v5417_v62  ;;  %v5478_v62 = vld [vmem:[#allocation5 + $0xba0] ss:$8 sps:$4 sm:$0xff]  }
 0x239   :  { %3050 = vmatpush1.bf16.msra.mxu0 %v5415_v1  ;;  %v5481_v1 = vld [vmem:[#allocation5 + $0xbb0] ss:$8 sps:$4 sm:$0xff]  }
 0x23a   :  { %3051 = vmatprep.subr.bf16.mxu0 %v5420_v2 }
 0x23d   :  { %3052 = vmatpush1.bf16.msra.mxu0 %v5418_v9 }
 0x23e   :  { %3053 = vmatprep.subr.bf16.mxu0 %v5423_v10  ;;  %v5484_v10 = vld [vmem:[#allocation5 + $0xbc0] ss:$8 sps:$4 sm:$0xff]  }
 0x241   :  { %3054 = vmatpush1.bf16.msra.mxu0 %v5421_v13  ;;  %v5492_v13 = vld [vmem:[#allocation5 + $0xbe4] ss:$8 sps:$4 sm:$0xff]  }
 0x242   :  { %3055 = vmatprep.subr.bf16.mxu0 %v5426_v14  ;;  %v5490_v14 = vld [vmem:[#allocation5 + $0xbe0] ss:$8 sps:$4 sm:$0xff]  }
 0x245   :  { %3056 = vmatpush1.bf16.msra.mxu0 %v5424_v6  ;;  %v4286_v6 = vcombine.low %v6161_v42, %v6163_v43 }
 0x246   :  { %3057 = vmatprep.subr.bf16.mxu0 %v5429_v7  ;;  %v5537_v7 = vld [vmem:[#allocation8 + $0xd4] ss:$8 sps:$4 sm:$0xff]  }
 0x247   :  { %3361 = vmatprep.subr.bf16.mxu1 %v5537_v7  ;;  %v3163_v7 = vld [vmem:[#allocation10] sm:$0x3] }
 0x248   :  { %3362 = vmatpush1.bf16.msra.mxu1 %v5535_v19 }
 0x249   :  { %3058 = vmatpush1.bf16.msra.mxu0 %v5427_v21  ;;  %v5538_v21 = vld [vmem:[#allocation8 + $0xe0] ss:$8 sps:$4 sm:$0xff]   ;;  %3363 = vmatprep.subr.bf16.mxu1 %v5540_v20 }
 0x24a   :  { %3059 = vmatprep.subr.bf16.mxu0 %v5432_v22  ;;  %v5543_v22 = vld [vmem:[#allocation8 + $0xf4] ss:$8 sps:$4 sm:$0xff]  }
 0x24c   :  { %3364 = vmatpush1.bf16.msra.mxu1 %v5538_v21 }
 0x24d   :  { %3060 = vmatpush1.bf16.msra.mxu0 %v5430_v25  ;;  %3365 = vmatprep.subr.bf16.mxu1 %v5543_v22  ;;  %v559_v25 = vlaneseq }
 0x24e   :  { %3061 = vmatprep.subr.bf16.mxu0 %v5435_v26 }
 0x24f   :  { %v6171_v26 = vshrl.u32 %v559_v25, 7 }
 0x250   :  { %3366 = vmatpush1.bf16.msra.mxu1 %v5541_v23 }
 0x251   :  { %3062 = vmatpush1.bf16.msra.mxu0 %v5433_v27  ;;  %3790 = vmatprep.subr.bf16.mxu1 %v5546_v24  ;;  %v6174_v5 = vsub.s32 0, %v6171_v26  ;;  %v6177_v27 = vsub.s32 1, %v6171_v26 }
 0x252   :  { %3063 = vmatprep.subr.bf16.mxu0 %v5438_v28 }
 0x253   :  { %v562_v28 = vrot.slane %v557_v8, %v6174_v5  ;;  %v566_v29 = vrot.slane %v557_v8, %v6177_v27  ;;  %v3168_v19 = vrot.slane %v3163_v7, %v6174_v5  ;;  %v3172_v21 = vrot.slane %v3163_v7, %v6177_v27  ;;  %v5653_v7 = vld [vmem:[#allocation14 + $0x30] sm:$0xff]  }
 0x255   :  { %3064 = vmatpush1.bf16.msra.mxu0 %v5436_v31 }
 0x256   :  { %3065 = vmatprep.subr.bf16.mxu0 %v5441_v32 }
 0x259   :  { %3066 = vmatpush1.bf16.msra.mxu0 %v5439_v34 }
 0x25a   :  { %3067 = vmatprep.subr.bf16.mxu0 %v5444_v35 }
 0x25d   :  { %3068 = vmatpush1.bf16.msra.mxu0 %v5442_v17 }
 0x25e   :  { %3069 = vmatprep.subr.bf16.mxu0 %v5447_v18 }
 0x261   :  { %3070 = vmatpush1.bf16.msra.mxu0 %v5445_v36 }
 0x262   :  { %3082 = vmatprep.subr.bf16.mxu0 %v5450_v39 }
 0x264   :  { %3072 = vmatmul.mubr.bf16.vlgmr.msra.gmra.mrb[0].mxu0 %v4284_v46 }
 0x265   :  { %3083 = vmatpush1.bf16.msra.mxu0 %v5448_v47  ;;  %3114 = vmatprep.mubr.bf16.mxu0 %v4287_v48 }
 0x266   :  { %3084 = vmatprep.subr.bf16.mxu0 %v5453_v49 }
 0x269   :  { %3085 = vmatpush1.bf16.msra.mxu0 %v5451_v50 }
 0x26a   :  { %3086 = vmatprep.subr.bf16.mxu0 %v5456_v51  ;;  %v5544_v51 = vld [vmem:[#allocation11] ss:$16 sps:$4 sm:$0xff]  }
 0x26d   :  { %3087 = vmatpush1.bf16.msra.mxu0 %v5454_v52 }
 0x26e   :  { %3088 = vmatprep.subr.bf16.mxu0 %v5459_v37  ;;  %v5549_v37 = vld [vmem:[#allocation11 + $0x24] ss:$16 sps:$4 sm:$0xff]  }
 0x271   :  { %3089 = vmatpush1.bf16.msra.mxu0 %v5457_v38  ;;  %v5547_v38 = vld [vmem:[#allocation11 + $0x20] ss:$16 sps:$4 sm:$0xff]  }
 0x272   :  { %3090 = vmatprep.subr.bf16.mxu0 %v5462_v44  ;;  %v5552_v44 = vld [vmem:[#allocation11 + $0x44] ss:$16 sps:$4 sm:$0xff]  }
 0x275   :  { %3091 = vmatpush1.bf16.msra.mxu0 %v5460_v45  ;;  %v5550_v45 = vld [vmem:[#allocation11 + $0x40] ss:$16 sps:$4 sm:$0xff]  }
 0x276   :  { %3092 = vmatprep.subr.bf16.mxu0 %v5465_v53  ;;  %v5555_v53 = vld [vmem:[#allocation11 + $0x64] ss:$16 sps:$4 sm:$0xff]  }
 0x279   :  { %3093 = vmatpush1.bf16.msra.mxu0 %v5463_v54  ;;  %v5553_v54 = vld [vmem:[#allocation11 + $0x60] ss:$16 sps:$4 sm:$0xff]  }
 0x27a   :  { %3094 = vmatprep.subr.bf16.mxu0 %v5468_v55  ;;  %v5558_v55 = vld [vmem:[#allocation11 + $0x84] ss:$16 sps:$4 sm:$0xff]  }
 0x27c   :  { %v2772_v0 = vpop.f32.mrb[0].mxu1 }
 0x27d   :  { %3095 = vmatpush1.bf16.msra.mxu0 %v5466_v56  ;;  %v2774_v2 = vpop.f32.mrb[1].mxu1  ;;  %v4854_v30 = vadd.f32 %v2772_v0, %v562_v28  ;;  %v5556_v56 = vld [vmem:[#allocation11 + $0x80] ss:$16 sps:$4 sm:$0xff]  }
 0x27e   :  { %3096 = vmatprep.subr.bf16.mxu0 %v5471_v57  ;;  %v2776_v4 = vpop.f32.mrb[2].mxu1  ;;  %v4856_v31 = vadd.f32 %v2774_v2, %v566_v29  ;;  %v5561_v57 = vld [vmem:[#allocation11 + $0xa4] ss:$16 sps:$4 sm:$0xff]   ;;  %v5571_v0 = vld [vmem:[#allocation11 + $0x120] ss:$16 sps:$4 sm:$0xff]  }
 0x27f   :  { %v2778_v9 = vpop.f32.mrb[3].mxu1  ;;  %v4858_v33 = vadd.f32 %v2776_v4, %v562_v28  ;;  %v5574_v2 = vld [vmem:[#allocation11 + $0x140] ss:$16 sps:$4 sm:$0xff]  }
 0x280   :  { %v4860_v17 = vadd.f32 %v2778_v9, %v566_v29  ;;  %v5577_v4 = vld [vmem:[#allocation11 + $0x160] ss:$16 sps:$4 sm:$0xff]   ;;  %v5582_v9 = vld [vmem:[#allocation11 + $0x184] ss:$16 sps:$4 sm:$0xff]  }
 0x281   :  { %3097 = vmatpush1.bf16.msra.mxu0 %v5469_v40  ;;  %v5559_v40 = vld [vmem:[#allocation11 + $0xa0] ss:$16 sps:$4 sm:$0xff]  }
 0x282   :  { %3098 = vmatprep.subr.bf16.mxu0 %v5474_v41  ;;  %v5564_v41 = vld [vmem:[#allocation11 + $0xc4] ss:$16 sps:$4 sm:$0xff]  }
 0x285   :  { %3099 = vmatpush1.bf16.msra.mxu0 %v5472_v58  ;;  %v5562_v58 = vld [vmem:[#allocation11 + $0xc0] ss:$16 sps:$4 sm:$0xff]  }
 0x286   :  { %3100 = vmatprep.subr.bf16.mxu0 %v5477_v59  ;;  %v5567_v59 = vld [vmem:[#allocation11 + $0xe4] ss:$16 sps:$4 sm:$0xff]  }
 0x289   :  { %3101 = vmatpush1.bf16.msra.mxu0 %v5475_v60  ;;  %v5565_v60 = vld [vmem:[#allocation11 + $0xe0] ss:$16 sps:$4 sm:$0xff]  }
 0x28a   :  { %3102 = vmatprep.subr.bf16.mxu0 %v5480_v61  ;;  %v5570_v61 = vld [vmem:[#allocation11 + $0x104] ss:$16 sps:$4 sm:$0xff]  }
 0x28d   :  { %3103 = vmatpush1.bf16.msra.mxu0 %v5478_v62  ;;  %v5568_v62 = vld [vmem:[#allocation11 + $0x100] ss:$16 sps:$4 sm:$0xff]  }
 0x28e   :  { %3104 = vmatprep.subr.bf16.mxu0 %v5483_v63  ;;  %v5573_v63 = vld [vmem:[#allocation11 + $0x124] ss:$16 sps:$4 sm:$0xff]  }
 0x291   :  { %3105 = vmatpush1.bf16.msra.mxu0 %v5481_v1  ;;  %v5576_v1 = vld [vmem:[#allocation11 + $0x144] ss:$16 sps:$4 sm:$0xff]  }
 0x292   :  { %3106 = vmatprep.subr.bf16.mxu0 %v5486_v3  ;;  %v5579_v3 = vld [vmem:[#allocation11 + $0x164] ss:$16 sps:$4 sm:$0xff]  }
 0x295   :  { %3107 = vmatpush1.bf16.msra.mxu0 %v5484_v10  ;;  %v5580_v10 = vld [vmem:[#allocation11 + $0x180] ss:$16 sps:$4 sm:$0xff]  }
 0x296   :  { %3108 = vmatprep.subr.bf16.mxu0 %v5489_v11  ;;  %v5585_v11 = vld [vmem:[#allocation11 + $0x1a4] ss:$16 sps:$4 sm:$0xff]  }
 0x299   :  { %3109 = vmatpush1.bf16.msra.mxu0 %v5487_v12  ;;  %v5583_v12 = vld [vmem:[#allocation11 + $0x1a0] ss:$16 sps:$4 sm:$0xff]  }
 0x29a   :  { %3110 = vmatprep.subr.bf16.mxu0 %v5492_v13  ;;  %v5588_v13 = vld [vmem:[#allocation11 + $0x1c4] ss:$16 sps:$4 sm:$0xff]  }
 0x29d   :  { %3111 = vmatpush1.bf16.msra.mxu0 %v5490_v14  ;;  %v5586_v14 = vld [vmem:[#allocation11 + $0x1c0] ss:$16 sps:$4 sm:$0xff]  }
 0x29e   :  { %3112 = vmatprep.subr.bf16.mxu0 %v5495_v15  ;;  %v5591_v15 = vld [vmem:[#allocation11 + $0x1e4] ss:$16 sps:$4 sm:$0xff]  }
 0x2a1   :  { %3113 = vmatpush1.bf16.msra.mxu0 %v5493_v16  ;;  %v5589_v16 = vld [vmem:[#allocation11 + $0x1e0] ss:$16 sps:$4 sm:$0xff]  }
 0x2a4   :  { %3115 = vmatmul.mubr.bf16.vlgmr.msra.gmra.mrb[0].mxu0 %v4286_v6  ;;  %v5594_v6 = vld [vmem:[#allocation11 + $0xc] ss:$16 sps:$4 sm:$0xff]  }
 0x377   :  { %v3116_v32 = vpop.f32.mrb[0].mxu0 }
 0x378   :  { %v4855_v34 = vadd.f32 %v4854_v30, %v3116_v32  ;;  %v3118_v35 = vpop.f32.mrb[1].mxu0 }
 0x379   :  { %v4857_v18 = vadd.f32 %v4856_v31, %v3118_v35  ;;  %v3120_v36 = vpop.f32.mrb[2].mxu0  ;;  %v5592_v35 = vld [vmem:[#allocation11 + $0x8] ss:$16 sps:$4 sm:$0xff]  }
 0x37a   :  { %v4859_v39 = vadd.f32 %v4858_v33, %v3120_v36  ;;  %v3122_v42 = vpop.f32.mrb[3].mxu0  ;;  %v5595_v36 = vld [vmem:[#allocation11 + $0x28] ss:$16 sps:$4 sm:$0xff]  }
 0x37b   :  { %v4861_v43 = vadd.f32 %v4860_v17, %v3122_v42  ;;  %v5598_v42 = vld [vmem:[#allocation11 + $0x48] ss:$16 sps:$4 sm:$0xff]  }
 0x37c   :  { %v3125_v46 = vpack.c.bf16 %v4859_v39, %v4855_v34  ;;  %v5600_v39 = vld [vmem:[#allocation11 + $0x4c] ss:$16 sps:$4 sm:$0xff]  }
 0x37d   :  { %v3126_v47 = vpack.c.bf16 %v4861_v43, %v4857_v18  ;;  %v5597_v18 = vld [vmem:[#allocation11 + $0x2c] ss:$16 sps:$4 sm:$0xff]  }
 0x37e   :  { %v3127_v48 = vmul.bf16 1036860877, %v3125_v46  ;;  %v5603_v43 = vld [vmem:[#allocation11 + $0x6c] ss:$16 sps:$4 sm:$0xff]  }
 0x37f   :  { %v3128_v49 = vmul.bf16 1036860877, %v3126_v47 }
 0x380   :  { %v3129_v52 = vmax.bf16 %v3127_v48, %v3125_v46  ;;  %v5601_v46 = vld [vmem:[#allocation11 + $0x68] ss:$16 sps:$4 sm:$0xff]  }
 0x381   :  { %v3130_v50 = vmax.bf16 %v3128_v49, %v3126_v47  ;;  %v5606_v47 = vld [vmem:[#allocation11 + $0x8c] ss:$16 sps:$4 sm:$0xff]   ;;  %v5604_v48 = vld [vmem:[#allocation11 + $0x88] ss:$16 sps:$4 sm:$0xff]  }
 0x382   :  { %v5609_v49 = vld [vmem:[#allocation11 + $0xac] ss:$16 sps:$4 sm:$0xff]  }
 0x383   :  { %3367 = vmatprep.mubr.bf16.mxu1 %v3130_v50  ;;  %v5607_v50 = vld [vmem:[#allocation11 + $0xa8] ss:$16 sps:$4 sm:$0xff]  }
 0x384   :  { %3368 = vmatmul.mubr.bf16.vlgmr.msra.gmra.mrb[4].mxu1 %v3129_v52  ;;  %v5610_v52 = vld [vmem:[#allocation11 + $0xc8] ss:$16 sps:$4 sm:$0xff]  }
 0x385   :  { %3791 = vmatpush1.bf16.msra.mxu1 %v5544_v51  ;;  %v5612_v51 = vld [vmem:[#allocation11 + $0xcc] ss:$16 sps:$4 sm:$0xff]  }
 0x386   :  { %3792 = vmatprep.subr.bf16.mxu1 %v5549_v37  ;;  %v5615_v37 = vld [vmem:[#allocation11 + $0xec] ss:$16 sps:$4 sm:$0xff]  }
 0x389   :  { %3793 = vmatpush1.bf16.msra.mxu1 %v5547_v38  ;;  %v5613_v38 = vld [vmem:[#allocation11 + $0xe8] ss:$16 sps:$4 sm:$0xff]  }
 0x38a   :  { %3794 = vmatprep.subr.bf16.mxu1 %v5552_v44  ;;  %v5618_v44 = vld [vmem:[#allocation11 + $0x10c] ss:$16 sps:$4 sm:$0xff]  }
 0x38d   :  { %3795 = vmatpush1.bf16.msra.mxu1 %v5550_v45  ;;  %v5616_v45 = vld [vmem:[#allocation11 + $0x108] ss:$16 sps:$4 sm:$0xff]  }
 0x38e   :  { %3796 = vmatprep.subr.bf16.mxu1 %v5555_v53  ;;  %v5621_v53 = vld [vmem:[#allocation11 + $0x12c] ss:$16 sps:$4 sm:$0xff]  }
 0x391   :  { %3797 = vmatpush1.bf16.msra.mxu1 %v5553_v54  ;;  %v5619_v54 = vld [vmem:[#allocation11 + $0x128] ss:$16 sps:$4 sm:$0xff]  }
 0x392   :  { %3798 = vmatprep.subr.bf16.mxu1 %v5558_v55  ;;  %v5624_v55 = vld [vmem:[#allocation11 + $0x14c] ss:$16 sps:$4 sm:$0xff]  }
 0x395   :  { %3799 = vmatpush1.bf16.msra.mxu1 %v5556_v56  ;;  %v5622_v56 = vld [vmem:[#allocation11 + $0x148] ss:$16 sps:$4 sm:$0xff]  }
 0x396   :  { %3800 = vmatprep.subr.bf16.mxu1 %v5561_v57  ;;  %v5627_v57 = vld [vmem:[#allocation11 + $0x16c] ss:$16 sps:$4 sm:$0xff]  }
 0x399   :  { %3801 = vmatpush1.bf16.msra.mxu1 %v5559_v40  ;;  %v5625_v40 = vld [vmem:[#allocation11 + $0x168] ss:$16 sps:$4 sm:$0xff]  }
 0x39a   :  { %3802 = vmatprep.subr.bf16.mxu1 %v5564_v41  ;;  %v5630_v41 = vld [vmem:[#allocation11 + $0x18c] ss:$16 sps:$4 sm:$0xff]  }
 0x39d   :  { %3803 = vmatpush1.bf16.msra.mxu1 %v5562_v58  ;;  %v5628_v58 = vld [vmem:[#allocation11 + $0x188] ss:$16 sps:$4 sm:$0xff]  }
 0x39e   :  { %3804 = vmatprep.subr.bf16.mxu1 %v5567_v59  ;;  %v5633_v59 = vld [vmem:[#allocation11 + $0x1ac] ss:$16 sps:$4 sm:$0xff]  }
 0x3a1   :  { %3805 = vmatpush1.bf16.msra.mxu1 %v5565_v60  ;;  %v5631_v60 = vld [vmem:[#allocation11 + $0x1a8] ss:$16 sps:$4 sm:$0xff]  }
 0x3a2   :  { %3806 = vmatprep.subr.bf16.mxu1 %v5570_v61  ;;  %v5636_v61 = vld [vmem:[#allocation11 + $0x1cc] ss:$16 sps:$4 sm:$0xff]  }
 0x3a5   :  { %3807 = vmatpush1.bf16.msra.mxu1 %v5568_v62  ;;  %v5634_v62 = vld [vmem:[#allocation11 + $0x1c8] ss:$16 sps:$4 sm:$0xff]  }
 0x3a6   :  { %3808 = vmatprep.subr.bf16.mxu1 %v5573_v63  ;;  %v5639_v63 = vld [vmem:[#allocation11 + $0x1ec] ss:$16 sps:$4 sm:$0xff]  }
 0x3a9   :  { %3809 = vmatpush1.bf16.msra.mxu1 %v5571_v0  ;;  %v5637_v0 = vld [vmem:[#allocation11 + $0x1e8] ss:$16 sps:$4 sm:$0xff]  }
 0x3aa   :  { %3810 = vmatprep.subr.bf16.mxu1 %v5576_v1  ;;  %v5640_v1 = vld [vmem:[#allocation14 + $0x40] sm:$0xff]  }
 0x3ad   :  { %3811 = vmatpush1.bf16.msra.mxu1 %v5574_v2  ;;  %v5641_v2 = vld [vmem:[#allocation14] sm:$0xff]  }
 0x3ae   :  { %3812 = vmatprep.subr.bf16.mxu1 %v5579_v3  ;;  %v5642_v3 = vld [vmem:[#allocation14 + $0x48] sm:$0xff]  }
 0x3b1   :  { %3813 = vmatpush1.bf16.msra.mxu1 %v5577_v4  ;;  %v5643_v4 = vld [vmem:[#allocation14 + $0x8] sm:$0xff]  }
 0x3b2   :  { %3814 = vmatprep.subr.bf16.mxu1 %v5582_v9  ;;  %v5644_v9 = vld [vmem:[#allocation14 + $0x50] sm:$0xff]  }
 0x3b5   :  { %3815 = vmatpush1.bf16.msra.mxu1 %v5580_v10  ;;  %v5645_v10 = vld [vmem:[#allocation14 + $0x10] sm:$0xff]  }
 0x3b6   :  { %3816 = vmatprep.subr.bf16.mxu1 %v5585_v11  ;;  %v5646_v11 = vld [vmem:[#allocation14 + $0x58] sm:$0xff]  }
 0x3b9   :  { %3817 = vmatpush1.bf16.msra.mxu1 %v5583_v12  ;;  %v5647_v12 = vld [vmem:[#allocation14 + $0x18] sm:$0xff]  }
 0x3ba   :  { %3818 = vmatprep.subr.bf16.mxu1 %v5588_v13  ;;  %v5648_v13 = vld [vmem:[#allocation14 + $0x60] sm:$0xff]  }
 0x3bd   :  { %3819 = vmatpush1.bf16.msra.mxu1 %v5586_v14  ;;  %v5649_v14 = vld [vmem:[#allocation14 + $0x20] sm:$0xff]  }
 0x3be   :  { %3820 = vmatprep.subr.bf16.mxu1 %v5591_v15  ;;  %v5650_v15 = vld [vmem:[#allocation14 + $0x68] sm:$0xff]  }
 0x3c1   :  { %3821 = vmatpush1.bf16.msra.mxu1 %v5589_v16  ;;  %v5651_v16 = vld [vmem:[#allocation14 + $0x28] sm:$0xff]  }
 0x3c2   :  { %3833 = vmatprep.subr.bf16.mxu1 %v5594_v6  ;;  %v5652_v6 = vld [vmem:[#allocation14 + $0x70] sm:$0xff]  }
 0x457   :  { %v3369_v20 = vpop.f32.mrb[4].mxu1 }
 0x458   :  { %v3371_v22 = vpop.f32.mrb[5].mxu1  ;;  %v3370_v24 = vadd.f32 %v3369_v20, %v3168_v19  ;;  %v5655_v20 = vld [vmem:[#allocation14 + $0x38] sm:$0xff]  }
 0x459   :  { %v3373_v23 = vpop.f32.mrb[6].mxu1  ;;  %v3372_v28 = vadd.f32 %v3371_v22, %v3172_v21  ;;  %v3448_v22 = vld [vmem:[#allocation13] sm:$0xf] }
 0x45a   :  { %v3374_v25 = vadd.f32 %v3373_v23, %v3168_v19  ;;  %v3375_v8 = vpop.f32.mrb[7].mxu1  ;;  %v5654_v19 = vld [vmem:[#allocation14 + $0x78] sm:$0xff]   ;;  %v3453_v23 = vrot.slane %v3448_v22, %v6174_v5  ;;  %v5659_v5 = vld [vmem:[#allocation14 + $0x88] sm:$0xff]  }
 0x45b   :  { %v3376_v29 = vadd.f32 %v3375_v8, %v3172_v21  ;;  %v5656_v21 = vld [vmem:[#allocation14 + $0xc0] sm:$0xff]  }
 0x45c   :  { %v3378_v30 = vpack.c.bf16 %v3374_v25, %v3370_v24  ;;  %v3457_v25 = vrot.slane %v3448_v22, %v6177_v27  ;;  %v5660_v27 = vld [vmem:[#allocation14 + $0xd0] sm:$0xff]  }
 0x45d   :  { %v3379_v31 = vpack.c.bf16 %v3376_v29, %v3372_v28 }
 0x45e   :  { %v3380_v32 = vmul.bf16 1036860877, %v3378_v30 }
 0x45f   :  { %v3381_v33 = vmul.bf16 1036860877, %v3379_v31 }
 0x460   :  { %v6183_v17 = vmax.bf16 %v3380_v32, %v3378_v30 }
 0x461   :  { %v3383_v34 = vmax.bf16 %v3381_v33, %v3379_v31 }
 0x463   :  { %3822 = vmatprep.mubr.bf16.mxu1 %v3383_v34 }
 0x464   :  { %3823 = vmatmul.mubr.bf16.vlgmr.msra.gmra.mrb[8].mxu1 %v6183_v17 }
 0x465   :  { %3834 = vmatpush1.bf16.msra.mxu1 %v5592_v35  ;;  %3865 = vmatprep.mubr.bf16.mxu1 %v3383_v34 }
 0x466   :  { %3835 = vmatprep.subr.bf16.mxu1 %v5597_v18 }
 0x469   :  { %3836 = vmatpush1.bf16.msra.mxu1 %v5595_v36 }
 0x46a   :  { %3837 = vmatprep.subr.bf16.mxu1 %v5600_v39  ;;  %v5657_v39 = vld [vmem:[#allocation14 + $0x80] sm:$0xff]  }
 0x46d   :  { %3838 = vmatpush1.bf16.msra.mxu1 %v5598_v42 }
 0x46e   :  { %3839 = vmatprep.subr.bf16.mxu1 %v5603_v43  ;;  %v5658_v43 = vld [vmem:[#allocation14 + $0xc8] sm:$0xff]  }
 0x471   :  { %3840 = vmatpush1.bf16.msra.mxu1 %v5601_v46  ;;  %v5661_v46 = vld [vmem:[#allocation14 + $0x90] sm:$0xff]  }
 0x472   :  { %3841 = vmatprep.subr.bf16.mxu1 %v5606_v47  ;;  %v5662_v47 = vld [vmem:[#allocation14 + $0xd8] sm:$0xff]  }
 0x475   :  { %3842 = vmatpush1.bf16.msra.mxu1 %v5604_v48  ;;  %v5663_v48 = vld [vmem:[#allocation14 + $0x98] sm:$0xff]  }
 0x476   :  { %3843 = vmatprep.subr.bf16.mxu1 %v5609_v49  ;;  %v5664_v49 = vld [vmem:[#allocation14 + $0xe0] sm:$0xff]  }
 0x479   :  { %3844 = vmatpush1.bf16.msra.mxu1 %v5607_v50  ;;  %v5665_v50 = vld [vmem:[#allocation14 + $0xa0] sm:$0xff]  }
 0x47a   :  { %3845 = vmatprep.subr.bf16.mxu1 %v5612_v51  ;;  %v5666_v51 = vld [vmem:[#allocation14 + $0xe8] sm:$0xff]  }
 0x47d   :  { %3846 = vmatpush1.bf16.msra.mxu1 %v5610_v52  ;;  %v5667_v52 = vld [vmem:[#allocation14 + $0xa8] sm:$0xff]  }
 0x47e   :  { %3847 = vmatprep.subr.bf16.mxu1 %v5615_v37  ;;  %v5668_v37 = vld [vmem:[#allocation14 + $0xf0] sm:$0xff]  }
 0x481   :  { %3848 = vmatpush1.bf16.msra.mxu1 %v5613_v38  ;;  %v5669_v38 = vld [vmem:[#allocation14 + $0xb0] sm:$0xff]  }
 0x482   :  { %3849 = vmatprep.subr.bf16.mxu1 %v5618_v44  ;;  %v5670_v44 = vld [vmem:[#allocation14 + $0xf8] sm:$0xff]  }
 0x485   :  { %3850 = vmatpush1.bf16.msra.mxu1 %v5616_v45  ;;  %v5671_v45 = vld [vmem:[#allocation14 + $0xb8] sm:$0xff]  }
 0x486   :  { %3851 = vmatprep.subr.bf16.mxu1 %v5621_v53  ;;  %v3460_v53 = vsub.s32 2, %v6171_v26 }
 0x489   :  { %3852 = vmatpush1.bf16.msra.mxu1 %v5619_v54  ;;  %v3464_v54 = vsub.s32 3, %v6171_v26 }
 0x48a   :  { %3853 = vmatprep.subr.bf16.mxu1 %v5624_v55  ;;  %v3461_v55 = vrot.slane %v3448_v22, %v3460_v53 }
 0x48d   :  { %3854 = vmatpush1.bf16.msra.mxu1 %v5622_v56 }
 0x48e   :  { %3855 = vmatprep.subr.bf16.mxu1 %v5627_v57  ;;  %v3465_v57 = vrot.slane %v3448_v22, %v3464_v54 }
 0x491   :  { %3856 = vmatpush1.bf16.msra.mxu1 %v5625_v40 }
 0x492   :  { %3857 = vmatprep.subr.bf16.mxu1 %v5630_v41 }
 0x495   :  { %3858 = vmatpush1.bf16.msra.mxu1 %v5628_v58 }
 0x496   :  { %3859 = vmatprep.subr.bf16.mxu1 %v5633_v59 }
 0x499   :  { %3860 = vmatpush1.bf16.msra.mxu1 %v5631_v60 }
 0x49a   :  { %3861 = vmatprep.subr.bf16.mxu1 %v5636_v61 }
 0x49d   :  { %3862 = vmatpush1.bf16.msra.mxu1 %v5634_v62 }
 0x49e   :  { %3863 = vmatprep.subr.bf16.mxu1 %v5639_v63 }
 0x4a1   :  { %3864 = vmatpush1.bf16.msra.mxu1 %v5637_v0 }
 0x4a2   :  { %4810 = vmatprep.subr.bf16.mxu1 %v5640_v1 }
 0x4a4   :  { %3866 = vmatmul.mubr.bf16.vlgmr.msra.gmra.mrb[12].mxu1 %v6183_v17 }
 0x4a5   :  { %4811 = vmatpush3.bf16.msra.mxu1 %v5641_v2 }
 0x4a6   :  { %4812 = vmatprep.subr.bf16.mxu1 %v5642_v3 }
 0x4a9   :  { %4813 = vmatpush3.bf16.msra.mxu1 %v5643_v4 }
 0x4aa   :  { %4814 = vmatprep.subr.bf16.mxu1 %v5644_v9 }
 0x4ad   :  { %4815 = vmatpush3.bf16.msra.mxu1 %v5645_v10 }
 0x4ae   :  { %4816 = vmatprep.subr.bf16.mxu1 %v5646_v11 }
 0x4b1   :  { %4817 = vmatpush3.bf16.msra.mxu1 %v5647_v12 }
 0x4b2   :  { %4818 = vmatprep.subr.bf16.mxu1 %v5648_v13 }
 0x4b5   :  { %4819 = vmatpush3.bf16.msra.mxu1 %v5649_v14  ;;  %v4768_v14 = vld [vmem:[#allocation16] ss:$0 sm:$0xff] }
 0x4b6   :  { %4820 = vmatprep.subr.bf16.mxu1 %v5650_v15 }
 0x4b9   :  { %4821 = vmatpush3.bf16.msra.mxu1 %v5651_v16 }
 0x4ba   :  { %4822 = vmatprep.subr.bf16.mxu1 %v5652_v6 }
 0x4bd   :  { %4823 = vmatpush3.bf16.msra.mxu1 %v5653_v7 }
 0x4be   :  { %4824 = vmatprep.subr.bf16.mxu1 %v5654_v19 }
 0x4c1   :  { %4825 = vmatpush3.bf16.msra.mxu1 %v5655_v20 }
 0x4c2   :  { %4832 = vmatprep.subr.bf16.mxu1 %v5656_v21 }
 0x537   :  { %v3824_v24 = vpop.f32.mrb[8].mxu1 }
 0x538   :  { %v3826_v8 = vpop.f32.mrb[9].mxu1  ;;  %v3825_v29 = vadd.f32 %v3824_v24, %v3453_v23 }
 0x539   :  { %v3828_v28 = vpop.f32.mrb[10].mxu1  ;;  %v3827_v32 = vadd.f32 %v3826_v8, %v3457_v25 }
 0x53a   :  { %v3829_v30 = vadd.f32 %v3828_v28, %v3453_v23  ;;  %v3830_v31 = vpop.f32.mrb[11].mxu1 }
 0x53b   :  { %v3831_v33 = vadd.f32 %v3830_v31, %v3457_v25 }
 0x53c   :  { %v3876_v34 = vpack.c.bf16 %v3829_v30, %v3825_v29 }
 0x53d   :  { %v3877_v35 = vpack.c.bf16 %v3831_v33, %v3827_v32 }
 0x53e   :  { %v3880_v17 = vmul.bf16 1036860877, %v3876_v34 }
 0x53f   :  { %v3881_v18 = vmul.bf16 1036860877, %v3877_v35 }
 0x540   :  { %v3884_v42 = vmax.bf16 %v3880_v17, %v3876_v34 }
 0x541   :  { %v3885_v36 = vmax.bf16 %v3881_v18, %v3877_v35 }
 0x543   :  { %4183 = vmatprep.mubr.bf16.mxu1 %v3885_v36 }
 0x544   :  { %4184 = vmatmul.mubr.bf16.vlgmr.msra.gmra.mrb[16].mxu1 %v3884_v42 }
 0x545   :  { %4833 = vmatpush3.bf16.msra.mxu1 %v5657_v39 }
 0x546   :  { %4834 = vmatprep.subr.bf16.mxu1 %v5658_v43 }
 0x549   :  { %4835 = vmatpush3.bf16.msra.mxu1 %v5659_v5 }
 0x54a   :  { %4836 = vmatprep.subr.bf16.mxu1 %v5660_v27 }
 0x54d   :  { %4837 = vmatpush3.bf16.msra.mxu1 %v5661_v46 }
 0x54e   :  { %4838 = vmatprep.subr.bf16.mxu1 %v5662_v47 }
 0x551   :  { %4839 = vmatpush3.bf16.msra.mxu1 %v5663_v48 }
 0x552   :  { %4840 = vmatprep.subr.bf16.mxu1 %v5664_v49 }
 0x555   :  { %4841 = vmatpush3.bf16.msra.mxu1 %v5665_v50 }
 0x556   :  { %4842 = vmatprep.subr.bf16.mxu1 %v5666_v51 }
 0x559   :  { %4843 = vmatpush3.bf16.msra.mxu1 %v5667_v52 }
 0x55a   :  { %4844 = vmatprep.subr.bf16.mxu1 %v5668_v37 }
 0x55d   :  { %4845 = vmatpush3.bf16.msra.mxu1 %v5669_v38 }
 0x55e   :  { %4846 = vmatprep.subr.bf16.mxu1 %v5670_v44 }
 0x561   :  { %4847 = vmatpush3.bf16.msra.mxu1 %v5671_v45 }
 0x577   :  { %v3867_v56 = vpop.f32.mrb[12].mxu1 }
 0x578   :  { %v3869_v40 = vpop.f32.mrb[13].mxu1  ;;  %v3868_v58 = vadd.f32 %v3867_v56, %v3461_v55 }
 0x579   :  { %v3871_v41 = vpop.f32.mrb[14].mxu1  ;;  %v3870_v61 = vadd.f32 %v3869_v40, %v3465_v57 }
 0x57a   :  { %v3872_v59 = vadd.f32 %v3871_v41, %v3461_v55  ;;  %v3873_v60 = vpop.f32.mrb[15].mxu1 }
 0x57b   :  { %v3874_v62 = vadd.f32 %v3873_v60, %v3465_v57 }
 0x57c   :  { %v3878_v63 = vpack.c.bf16 %v3872_v59, %v3868_v58 }
 0x57d   :  { %v3879_v0 = vpack.c.bf16 %v3874_v62, %v3870_v61 }
 0x57e   :  { %v3882_v1 = vmul.bf16 1036860877, %v3878_v63 }
 0x57f   :  { %v3883_v2 = vmul.bf16 1036860877, %v3879_v0 }
 0x580   :  { %v3886_v4 = vmax.bf16 %v3882_v1, %v3878_v63 }
 0x581   :  { %v3887_v3 = vmax.bf16 %v3883_v2, %v3879_v0 }
 0x583   :  { %4224 = vmatprep.mubr.bf16.mxu1 %v3887_v3 }
 0x584   :  { %4225 = vmatmul.mubr.bf16.vlgmr.msra.gmra.mrb[20].mxu1 %v3886_v4 }
 0x617   :  { %v4826_v9 = vpop.f32.mrb[16].mxu1 }
 0x618   :  { %v4827_v26 = vpop.f32.mrb[17].mxu1 }
 0x619   :  { %v4828_v10 = vadd.f32 %v4827_v26, %v4826_v9  ;;  %v4829_v11 = vpop.f32.mrb[18].mxu1 }
 0x61a   :  { %v4830_v12 = vpop.f32.mrb[19].mxu1 }
 0x61b   :  { %v4831_v13 = vadd.f32 %v4830_v12, %v4829_v11  ;;  %v4186_v6 = vadd.f32 %v4828_v10, %v4768_v14 }
 0x61d   :  { %v4189_v21 = vadd.f32 %v4831_v13, %v4768_v14 }
 0x657   :  { %v4848_v15 = vpop.f32.mrb[20].mxu1 }
 0x658   :  { %v4849_v16 = vpop.f32.mrb[21].mxu1 }
 0x659   :  { %v4850_v7 = vadd.f32 %v4849_v16, %v4848_v15  ;;  %v4851_v19 = vpop.f32.mrb[22].mxu1 }
 0x65a   :  { %v4852_v20 = vpop.f32.mrb[23].mxu1 }
 0x65b   :  { %v4227_v22 = vadd.f32 %v4850_v7, %v4186_v6  ;;  %v4853_v23 = vadd.f32 %v4852_v20, %v4851_v19 }
 0x65d   :  { %v4230_v24 = vadd.f32 %v4853_v23, %v4189_v21 }
 0x65f   :  { %v4808_v25 = vpack.c.bf16 %v4230_v24, %v4227_v22 }
 0x661   :  { %4809 = vst [vmem:[#allocation17] sm:$0xff] %v4808_v25  }
 0x662   :  { %5881 = shalt.err (!%p5878_p6)
}
 0x663   :  { %s5882_s11 = scalar_lea.hbm %s6215_s9, 128 }
 0x664   :  { %p5883_p7 = scmp.ne.s32.totalorder %s6215_s9, %s5882_s11  ;;  %p5886_p8 = scmp.lt.u32.totalorder %s5882_s11, %s6215_s9 }
 0x666   :  { %p5888_p9 = pnand %p5886_p8, %p5883_p7 }
 0x668   :  { %5891 = shalt.err (!%p5888_p9)
}
 0x669   :  { %4254 = dma.vmem_to_hbm [thread:$0]  %s4249_s2, 128, %s6215_s9, [#allocation4], %s5912_s5, %s5912_s5, %s5913_s26  }
 0x66a   :  { %5902 = dma.done.wait [#allocation4], 128  }
 0x66b   :  { %5903 = vsyncadd [#allocation4], 4294967168 }
 0x66c   :  { %4258 = vsyncpa [#allocation3], 1 }
 0x66d   :  { %4259 = vsyncpa [#allocation6], 1 }
 0x66e   :  { %4260 = vsyncpa [#allocation9], 1 }
 0x66f   :  { %4261 = vsyncpa [#allocation12], 1 }
 0x670   :  { %4262 = vsyncpa [#allocation15], 1 }
 0x671   :  { %4263 = vsyncpa [#allocation4], 1 }

</bundles_post_ra>
